<compile_context>
chip_gen: v7x
topology: tpu7x:2x2x1
jax: 0.10.0
libtpu: 0.0.40
codegen_flags: <defaults>
</compile_context>

<pallas_src>
import functools

import jax
import jax.numpy as jnp
import numpy as np
from jax.experimental import pallas as pl
from jax.experimental.pallas import tpu as pltpu

# ------------------------- model hyper-parameters ---------------------------
VOCAB_SIZE = 256          # synthetic small vocab (real model: DistilBert 30522)
EMBEDDING_DIM = 128
RNN_HIDDEN = 64           # logical LSTM hidden size (matches the PyTorch model)
HIDDEN_PAD = 128          # lane-padded hidden size used inside the kernel
NUM_INPUT_SIZE = 16
TEXT_FEAT = 128           # text_fc output width
OUTPUT_SIZE = 8
OUT_PAD = 128             # lane-dense padded output width
BATCH = 2
SEQ = 8


# --------------------------- fused forward kernel ---------------------------
def fused_forward_kernel(x_ref, num_ref,
                         wih_ref, whh_ref, b_ref,
                         wtf_ref, btf_ref,
                         wn1_ref, bn1_ref, wn2_ref, bn2_ref,
                         wc1t_ref, wc1n_ref, bc1_ref,
                         wc2_ref, bc2_ref,
                         out_ref, *, seq_len, batch, hidden_pad):
    """Embeddings (time-major, already gathered) -> LSTM -> fused MLP head."""
    HP = hidden_pad

    # ---- hoisted input projection: one matmul covers all T timesteps --------
    # x_ref: (T*B, E) time-major.  x_proj row t*B + b is timestep t, batch b.
    x_proj = (jnp.dot(x_ref[...], wih_ref[...],
                      preferred_element_type=jnp.float32) + b_ref[...])

    whh = whh_ref[...]                                   # (HP, 4*HP), kept in vregs

    # ---- LSTM recurrence, fully unrolled (static T) --------------------------
    h = jnp.zeros((batch, HP), jnp.float32)
    c = jnp.zeros((batch, HP), jnp.float32)
    for t in range(seq_len):                             # unrolled at trace time
        gates = (x_proj[t * batch:(t + 1) * batch, :]    # static row slice
                 + jnp.dot(h, whh, preferred_element_type=jnp.float32))
        # PyTorch gate order i, f, g, o; each slice is a full 128-lane group.
        i_g = jax.nn.sigmoid(gates[:, 0 * HP:1 * HP])
        f_g = jax.nn.sigmoid(gates[:, 1 * HP:2 * HP])
        g_g = jnp.tanh(gates[:, 2 * HP:3 * HP])
        o_g = jax.nn.sigmoid(gates[:, 3 * HP:4 * HP])
        c = f_g * c + i_g * g_g
        h = o_g * jnp.tanh(c)
    # Padded hidden/cell lanes stay exactly zero (zero-padded weights/bias).

    # ---- head: text_fc, num_fc MLP, concat-free fc_combined -----------------
    text_feat = (jnp.dot(h, wtf_ref[...],
                         preferred_element_type=jnp.float32) + btf_ref[...])
    n1 = jnp.maximum(
        jnp.dot(num_ref[...], wn1_ref[...],
                preferred_element_type=jnp.float32) + bn1_ref[...], 0.0)
    n2 = jnp.maximum(
        jnp.dot(n1, wn2_ref[...],
                preferred_element_type=jnp.float32) + bn2_ref[...], 0.0)
    # concat-free: w_c1 split into text / num halves.
    c1 = jnp.maximum(
        jnp.dot(text_feat, wc1t_ref[...], preferred_element_type=jnp.float32)
        + jnp.dot(n2, wc1n_ref[...], preferred_element_type=jnp.float32)
        + bc1_ref[...], 0.0)
    # lane-dense padded output (B, OUT_PAD); wrapper slices to OUTPUT_SIZE.
    out_ref[...] = (jnp.dot(c1, wc2_ref[...],
                            preferred_element_type=jnp.float32)
                    + bc2_ref[...]).astype(out_ref.dtype)


# ------------------------------ full forward --------------------------------
@jax.jit
def hybrid_rnn_forward(kp, num_inputs, input_ids):
    # Embedding lookup stays an XLA gather; table stays in HBM (never a
    # whole-table VMEM BlockSpec).
    emb = jnp.take(kp["embedding"], input_ids, axis=0)           # (B, T, E)
    B, T, E = emb.shape
    x_tm = jnp.transpose(emb, (1, 0, 2)).reshape(T * B, E)       # time-major flat
    x_tm = x_tm.astype(jnp.float32)

    vmem = pl.BlockSpec(memory_space=pltpu.MemorySpace.VMEM)
    args = (x_tm, num_inputs,
            kp["w_ih_p"], kp["w_hh_p"], kp["b_p"],
            kp["w_tf_p"], kp["b_tf"],
            kp["w_n1"], kp["b_n1"], kp["w_n2"], kp["b_n2"],
            kp["w_c1_text"], kp["w_c1_num"], kp["b_c1"],
            kp["w_c2_p"], kp["b_c2_p"])

    kernel = functools.partial(fused_forward_kernel,
                               seq_len=T, batch=B, hidden_pad=HIDDEN_PAD)
    out_pad = pl.pallas_call(
        kernel,
        out_shape=jax.ShapeDtypeStruct((B, OUT_PAD), jnp.float32),
        in_specs=[vmem] * len(args),
        out_specs=vmem,
    )(*args)
    return out_pad[:, :OUTPUT_SIZE]


# ----------------------------- parameter setup ------------------------------
def init_params(key):
    """Logical (unpadded) parameters, PyTorch-equivalent shapes/layout."""
    ks = jax.random.split(key, 12)
    s = 0.1

    def rnd(k, shape):
        return jax.random.normal(k, shape, dtype=jnp.float32) * s

    H, E = RNN_HIDDEN, EMBEDDING_DIM
    return {
        "embedding": rnd(ks[0], (VOCAB_SIZE, E)),
        # LSTM weights stored transposed (in_dim, 4H) for x @ W layout;
        # gate order i, f, g, o (PyTorch convention).
        "w_ih": rnd(ks[1], (E, 4 * H)),
        "w_hh": rnd(ks[2], (H, 4 * H)),
        # combined bias b_ih + b_hh (real PyTorch weights must be summed).
        "b_lstm": rnd(ks[3], (1, 4 * H)),
        # text_fc: Linear(H, 128)
        "w_tf": rnd(ks[4], (H, TEXT_FEAT)),
        "b_tf": rnd(ks[5], (1, TEXT_FEAT)),
        # num_fc: Linear(16, 64) -> ReLU -> Linear(64, 128) -> ReLU
        "w_n1": rnd(ks[6], (NUM_INPUT_SIZE, 64)),
        "b_n1": rnd(ks[7], (1, 64)),
        "w_n2": rnd(ks[8], (64, 128)),
        "b_n2": rnd(ks[9], (1, 128)),
        # fc_combined: Linear(256, 128) -> ReLU -> Linear(128, OUTPUT_SIZE)
        "w_c1": rnd(ks[10], (256, 128)),
        "b_c1": jnp.zeros((1, 128), jnp.float32),
        "w_c2": rnd(ks[11], (128, OUTPUT_SIZE)),
        "b_c2": jnp.zeros((1, OUTPUT_SIZE), jnp.float32),
    }


def prepare_kernel_params(p):
    """Build lane-aligned / concat-free kernel parameters from logical ones."""
    H, HP = RNN_HIDDEN, HIDDEN_PAD

    def pad_gate_cols(w):
        # (in, 4H) -> (in, 4*HP): zero-pad each of the 4 gate blocks to HP lanes.
        blocks = jnp.split(w, 4, axis=-1)
        return jnp.concatenate(
            [jnp.pad(b, ((0, 0), (0, HP - H))) for b in blocks], axis=-1)

    w_ih_p = pad_gate_cols(p["w_ih"])                                  # (E, 4*HP)
    w_hh_p = jnp.pad(pad_gate_cols(p["w_hh"]), ((0, HP - H), (0, 0)))  # (HP, 4*HP)
    b_p = pad_gate_cols(p["b_lstm"])                                   # (1, 4*HP)
    w_tf_p = jnp.pad(p["w_tf"], ((0, HP - H), (0, 0)))                 # (HP, 128)
    w_c1_text = p["w_c1"][:TEXT_FEAT]                                  # (128, 128)
    w_c1_num = p["w_c1"][TEXT_FEAT:]                                   # (128, 128)
    w_c2_p = jnp.pad(p["w_c2"], ((0, 0), (0, OUT_PAD - OUTPUT_SIZE)))  # (128, OUT_PAD)
    b_c2_p = jnp.pad(p["b_c2"], ((0, 0), (0, OUT_PAD - OUTPUT_SIZE)))  # (1, OUT_PAD)
    return {
        "embedding": p["embedding"],
        "w_ih_p": w_ih_p, "w_hh_p": w_hh_p, "b_p": b_p,
        "w_tf_p": w_tf_p, "b_tf": p["b_tf"],
        "w_n1": p["w_n1"], "b_n1": p["b_n1"],
        "w_n2": p["w_n2"], "b_n2": p["b_n2"],
        "w_c1_text": w_c1_text, "w_c1_num": w_c1_num, "b_c1": p["b_c1"],
        "w_c2_p": w_c2_p, "b_c2_p": b_c2_p,
    }


# --------------------------- pure-JAX reference ------------------------------
def reference_forward(params, num_inputs, input_ids):
    hi = jax.lax.Precision.HIGHEST

    def mm(a, b):
        return jnp.dot(a, b, precision=hi)

    emb = jnp.take(params["embedding"], input_ids, axis=0)       # (B, T, E)
    B = input_ids.shape[0]
    H = RNN_HIDDEN

    def step(carry, x_t):
        h, c = carry
        gates = (mm(x_t, params["w_ih"]) + mm(h, params["w_hh"])
                 + params["b_lstm"][0])
        i_g, f_g, g_g, o_g = jnp.split(gates, 4, axis=-1)
        i_g = jax.nn.sigmoid(i_g)
        f_g = jax.nn.sigmoid(f_g)
        g_g = jnp.tanh(g_g)
        o_g = jax.nn.sigmoid(o_g)
        c = f_g * c + i_g * g_g
        h = o_g * jnp.tanh(c)
        return (h, c), None

    xs = jnp.transpose(emb, (1, 0, 2))
    (h, _), _ = jax.lax.scan(step, (jnp.zeros((B, H)), jnp.zeros((B, H))), xs)

    text_feat = mm(h, params["w_tf"]) + params["b_tf"]
    n1 = jnp.maximum(mm(num_inputs, params["w_n1"]) + params["b_n1"], 0.0)
    n2 = jnp.maximum(mm(n1, params["w_n2"]) + params["b_n2"], 0.0)
    combined = jnp.concatenate([text_feat, n2], axis=1)
    c1 = jnp.maximum(mm(combined, params["w_c1"]) + params["b_c1"], 0.0)
    return mm(c1, params["w_c2"]) + params["b_c2"]


# ---------------------------------- main -------------------------------------
if __name__ == "__main__":
    key = jax.random.PRNGKey(0)
    k_params, k_ids, k_num = jax.random.split(key, 3)

    params = init_params(k_params)
    kparams = prepare_kernel_params(params)

    input_ids = jax.random.randint(k_ids, (BATCH, SEQ), 0, VOCAB_SIZE,
                                   dtype=jnp.int32)
    num_inputs = jax.random.normal(k_num, (BATCH, NUM_INPUT_SIZE),
                                   dtype=jnp.float32)

    out = hybrid_rnn_forward(kparams, num_inputs, input_ids)
    out = jax.block_until_ready(out)

    ref = jax.block_until_ready(reference_forward(params, num_inputs, input_ids))
    np.testing.assert_allclose(np.asarray(out), np.asarray(ref),
                               atol=1e-4, rtol=1e-4)
    assert out.shape == (BATCH, OUTPUT_SIZE)
    print("KERNEL_OK")
</pallas_src>

<mosaic_0001>
module attributes {stable_mosaic.version = 11 : i64} {
  func.func @fused_forward_kernel(%arg0: memref<16x128xf32, #tpu.memory_space<vmem>>, %arg1: memref<2x16xf32, #tpu.memory_space<vmem>>, %arg2: memref<128x512xf32, #tpu.memory_space<vmem>>, %arg3: memref<128x512xf32, #tpu.memory_space<vmem>>, %arg4: memref<1x512xf32, #tpu.memory_space<vmem>>, %arg5: memref<128x128xf32, #tpu.memory_space<vmem>>, %arg6: memref<1x128xf32, #tpu.memory_space<vmem>>, %arg7: memref<16x64xf32, #tpu.memory_space<vmem>>, %arg8: memref<1x64xf32, #tpu.memory_space<vmem>>, %arg9: memref<64x128xf32, #tpu.memory_space<vmem>>, %arg10: memref<1x128xf32, #tpu.memory_space<vmem>>, %arg11: memref<128x128xf32, #tpu.memory_space<vmem>>, %arg12: memref<128x128xf32, #tpu.memory_space<vmem>>, %arg13: memref<1x128xf32, #tpu.memory_space<vmem>>, %arg14: memref<128x128xf32, #tpu.memory_space<vmem>>, %arg15: memref<1x128xf32, #tpu.memory_space<vmem>>, %arg16: memref<2x128xf32, #tpu.memory_space<vmem>>) attributes {dimension_semantics = [], scalar_prefetch = 0 : i64, scratch_operands = 0 : i64, tpu.core_type = #tpu.core_type<tc>} {
    %c0 = arith.constant 0 : index
    %c0_0 = arith.constant 0 : index
    %0 = vector.load %arg0[%c0, %c0_0] : memref<16x128xf32, #tpu.memory_space<vmem>>, vector<16x128xf32>
    %c0_1 = arith.constant 0 : index
    %c0_2 = arith.constant 0 : index
    %1 = vector.load %arg2[%c0_1, %c0_2] : memref<128x512xf32, #tpu.memory_space<vmem>>, vector<128x512xf32>
    %cst = arith.constant dense<0.000000e+00> : vector<16x512xf32>
    %2 = tpu.matmul %0, %1, %cst {dimension_numbers = #tpu.dot_dimension_numbers<[1], [0], [0], [1], [0, 0, 1, 1], [], []>} : vector<16x128xf32>, vector<128x512xf32>, vector<16x512xf32> -> vector<16x512xf32>
    %c0_3 = arith.constant 0 : index
    %c0_4 = arith.constant 0 : index
    %3 = vector.load %arg4[%c0_3, %c0_4] : memref<1x512xf32, #tpu.memory_space<vmem>>, vector<1x512xf32>
    %4 = vector.broadcast %3 : vector<1x512xf32> to vector<16x512xf32>
    %5 = arith.addf %2, %4 : vector<16x512xf32>
    %c0_5 = arith.constant 0 : index
    %c0_6 = arith.constant 0 : index
    %6 = vector.load %arg3[%c0_5, %c0_6] : memref<128x512xf32, #tpu.memory_space<vmem>>, vector<128x512xf32>
    %cst_7 = arith.constant 0.000000e+00 : f32
    %7 = vector.broadcast %cst_7 : f32 to vector<2x128xf32>
    %cst_8 = arith.constant 0.000000e+00 : f32
    %8 = vector.broadcast %cst_8 : f32 to vector<2x128xf32>
    %9 = vector.extract_strided_slice %5 {offsets = [0, 0], sizes = [2, 512], strides = [1, 1]} : vector<16x512xf32> to vector<2x512xf32>
    %cst_9 = arith.constant dense<0.000000e+00> : vector<2x512xf32>
    %10 = tpu.matmul %7, %6, %cst_9 {dimension_numbers = #tpu.dot_dimension_numbers<[1], [0], [0], [1], [0, 0, 1, 1], [], []>} : vector<2x128xf32>, vector<128x512xf32>, vector<2x512xf32> -> vector<2x512xf32>
    %11 = arith.addf %9, %10 : vector<2x512xf32>
    %12 = vector.extract_strided_slice %11 {offsets = [0, 0], sizes = [2, 128], strides = [1, 1]} : vector<2x512xf32> to vector<2x128xf32>
    %13 = arith.negf %12 : vector<2x128xf32>
    %14 = math.exp %13 : vector<2x128xf32>
    %cst_10 = arith.constant 1.000000e+00 : f32
    %15 = vector.broadcast %cst_10 : f32 to vector<2x128xf32>
    %16 = arith.addf %15, %14 : vector<2x128xf32>
    %17 = arith.divf %15, %16 : vector<2x128xf32>
    %18 = vector.extract_strided_slice %11 {offsets = [0, 128], sizes = [2, 128], strides = [1, 1]} : vector<2x512xf32> to vector<2x128xf32>
    %19 = arith.negf %18 : vector<2x128xf32>
    %20 = math.exp %19 : vector<2x128xf32>
    %cst_11 = arith.constant 1.000000e+00 : f32
    %21 = vector.broadcast %cst_11 : f32 to vector<2x128xf32>
    %22 = arith.addf %21, %20 : vector<2x128xf32>
    %23 = arith.divf %21, %22 : vector<2x128xf32>
    %24 = vector.extract_strided_slice %11 {offsets = [0, 256], sizes = [2, 128], strides = [1, 1]} : vector<2x512xf32> to vector<2x128xf32>
    %25 = math.tanh %24 : vector<2x128xf32>
    %26 = vector.extract_strided_slice %11 {offsets = [0, 384], sizes = [2, 128], strides = [1, 1]} : vector<2x512xf32> to vector<2x128xf32>
    %27 = arith.negf %26 : vector<2x128xf32>
    %28 = math.exp %27 : vector<2x128xf32>
    %cst_12 = arith.constant 1.000000e+00 : f32
    %29 = vector.broadcast %cst_12 : f32 to vector<2x128xf32>
    %30 = arith.addf %29, %28 : vector<2x128xf32>
    %31 = arith.divf %29, %30 : vector<2x128xf32>
    %32 = arith.mulf %23, %8 : vector<2x128xf32>
    %33 = arith.mulf %17, %25 : vector<2x128xf32>
    %34 = arith.addf %32, %33 : vector<2x128xf32>
    %35 = math.tanh %34 : vector<2x128xf32>
    %36 = arith.mulf %31, %35 : vector<2x128xf32>
    %37 = vector.extract_strided_slice %5 {offsets = [2, 0], sizes = [2, 512], strides = [1, 1]} : vector<16x512xf32> to vector<2x512xf32>
    %cst_13 = arith.constant dense<0.000000e+00> : vector<2x512xf32>
    %38 = tpu.matmul %36, %6, %cst_13 {dimension_numbers = #tpu.dot_dimension_numbers<[1], [0], [0], [1], [0, 0, 1, 1], [], []>} : vector<2x128xf32>, vector<128x512xf32>, vector<2x512xf32> -> vector<2x512xf32>
    %39 = arith.addf %37, %38 : vector<2x512xf32>
    %40 = vector.extract_strided_slice %39 {offsets = [0, 0], sizes = [2, 128], strides = [1, 1]} : vector<2x512xf32> to vector<2x128xf32>
    %41 = arith.negf %40 : vector<2x128xf32>
    %42 = math.exp %41 : vector<2x128xf32>
    %cst_14 = arith.constant 1.000000e+00 : f32
    %43 = vector.broadcast %cst_14 : f32 to vector<2x128xf32>
    %44 = arith.addf %43, %42 : vector<2x128xf32>
    %45 = arith.divf %43, %44 : vector<2x128xf32>
    %46 = vector.extract_strided_slice %39 {offsets = [0, 128], sizes = [2, 128], strides = [1, 1]} : vector<2x512xf32> to vector<2x128xf32>
    %47 = arith.negf %46 : vector<2x128xf32>
    %48 = math.exp %47 : vector<2x128xf32>
    %cst_15 = arith.constant 1.000000e+00 : f32
    %49 = vector.broadcast %cst_15 : f32 to vector<2x128xf32>
    %50 = arith.addf %49, %48 : vector<2x128xf32>
    %51 = arith.divf %49, %50 : vector<2x128xf32>
    %52 = vector.extract_strided_slice %39 {offsets = [0, 256], sizes = [2, 128], strides = [1, 1]} : vector<2x512xf32> to vector<2x128xf32>
    %53 = math.tanh %52 : vector<2x128xf32>
    %54 = vector.extract_strided_slice %39 {offsets = [0, 384], sizes = [2, 128], strides = [1, 1]} : vector<2x512xf32> to vector<2x128xf32>
    %55 = arith.negf %54 : vector<2x128xf32>
    %56 = math.exp %55 : vector<2x128xf32>
    %cst_16 = arith.constant 1.000000e+00 : f32
    %57 = vector.broadcast %cst_16 : f32 to vector<2x128xf32>
    %58 = arith.addf %57, %56 : vector<2x128xf32>
    %59 = arith.divf %57, %58 : vector<2x128xf32>
    %60 = arith.mulf %51, %34 : vector<2x128xf32>
    %61 = arith.mulf %45, %53 : vector<2x128xf32>
    %62 = arith.addf %60, %61 : vector<2x128xf32>
    %63 = math.tanh %62 : vector<2x128xf32>
    %64 = arith.mulf %59, %63 : vector<2x128xf32>
    %65 = vector.extract_strided_slice %5 {offsets = [4, 0], sizes = [2, 512], strides = [1, 1]} : vector<16x512xf32> to vector<2x512xf32>
    %cst_17 = arith.constant dense<0.000000e+00> : vector<2x512xf32>
    %66 = tpu.matmul %64, %6, %cst_17 {dimension_numbers = #tpu.dot_dimension_numbers<[1], [0], [0], [1], [0, 0, 1, 1], [], []>} : vector<2x128xf32>, vector<128x512xf32>, vector<2x512xf32> -> vector<2x512xf32>
    %67 = arith.addf %65, %66 : vector<2x512xf32>
    %68 = vector.extract_strided_slice %67 {offsets = [0, 0], sizes = [2, 128], strides = [1, 1]} : vector<2x512xf32> to vector<2x128xf32>
    %69 = arith.negf %68 : vector<2x128xf32>
    %70 = math.exp %69 : vector<2x128xf32>
    %cst_18 = arith.constant 1.000000e+00 : f32
    %71 = vector.broadcast %cst_18 : f32 to vector<2x128xf32>
    %72 = arith.addf %71, %70 : vector<2x128xf32>
    %73 = arith.divf %71, %72 : vector<2x128xf32>
    %74 = vector.extract_strided_slice %67 {offsets = [0, 128], sizes = [2, 128], strides = [1, 1]} : vector<2x512xf32> to vector<2x128xf32>
    %75 = arith.negf %74 : vector<2x128xf32>
    %76 = math.exp %75 : vector<2x128xf32>
    %cst_19 = arith.constant 1.000000e+00 : f32
    %77 = vector.broadcast %cst_19 : f32 to vector<2x128xf32>
    %78 = arith.addf %77, %76 : vector<2x128xf32>
    %79 = arith.divf %77, %78 : vector<2x128xf32>
    %80 = vector.extract_strided_slice %67 {offsets = [0, 256], sizes = [2, 128], strides = [1, 1]} : vector<2x512xf32> to vector<2x128xf32>
    %81 = math.tanh %80 : vector<2x128xf32>
    %82 = vector.extract_strided_slice %67 {offsets = [0, 384], sizes = [2, 128], strides = [1, 1]} : vector<2x512xf32> to vector<2x128xf32>
    %83 = arith.negf %82 : vector<2x128xf32>
    %84 = math.exp %83 : vector<2x128xf32>
    %cst_20 = arith.constant 1.000000e+00 : f32
    %85 = vector.broadcast %cst_20 : f32 to vector<2x128xf32>
    %86 = arith.addf %85, %84 : vector<2x128xf32>
    %87 = arith.divf %85, %86 : vector<2x128xf32>
    %88 = arith.mulf %79, %62 : vector<2x128xf32>
    %89 = arith.mulf %73, %81 : vector<2x128xf32>
    %90 = arith.addf %88, %89 : vector<2x128xf32>
    %91 = math.tanh %90 : vector<2x128xf32>
    %92 = arith.mulf %87, %91 : vector<2x128xf32>
    %93 = vector.extract_strided_slice %5 {offsets = [6, 0], sizes = [2, 512], strides = [1, 1]} : vector<16x512xf32> to vector<2x512xf32>
    %cst_21 = arith.constant dense<0.000000e+00> : vector<2x512xf32>
    %94 = tpu.matmul %92, %6, %cst_21 {dimension_numbers = #tpu.dot_dimension_numbers<[1], [0], [0], [1], [0, 0, 1, 1], [], []>} : vector<2x128xf32>, vector<128x512xf32>, vector<2x512xf32> -> vector<2x512xf32>
    %95 = arith.addf %93, %94 : vector<2x512xf32>
    %96 = vector.extract_strided_slice %95 {offsets = [0, 0], sizes = [2, 128], strides = [1, 1]} : vector<2x512xf32> to vector<2x128xf32>
    %97 = arith.negf %96 : vector<2x128xf32>
    %98 = math.exp %97 : vector<2x128xf32>
    %cst_22 = arith.constant 1.000000e+00 : f32
    %99 = vector.broadcast %cst_22 : f32 to vector<2x128xf32>
    %100 = arith.addf %99, %98 : vector<2x128xf32>
    %101 = arith.divf %99, %100 : vector<2x128xf32>
    %102 = vector.extract_strided_slice %95 {offsets = [0, 128], sizes = [2, 128], strides = [1, 1]} : vector<2x512xf32> to vector<2x128xf32>
    %103 = arith.negf %102 : vector<2x128xf32>
    %104 = math.exp %103 : vector<2x128xf32>
    %cst_23 = arith.constant 1.000000e+00 : f32
    %105 = vector.broadcast %cst_23 : f32 to vector<2x128xf32>
    %106 = arith.addf %105, %104 : vector<2x128xf32>
    %107 = arith.divf %105, %106 : vector<2x128xf32>
    %108 = vector.extract_strided_slice %95 {offsets = [0, 256], sizes = [2, 128], strides = [1, 1]} : vector<2x512xf32> to vector<2x128xf32>
    %109 = math.tanh %108 : vector<2x128xf32>
    %110 = vector.extract_strided_slice %95 {offsets = [0, 384], sizes = [2, 128], strides = [1, 1]} : vector<2x512xf32> to vector<2x128xf32>
    %111 = arith.negf %110 : vector<2x128xf32>
    %112 = math.exp %111 : vector<2x128xf32>
    %cst_24 = arith.constant 1.000000e+00 : f32
    %113 = vector.broadcast %cst_24 : f32 to vector<2x128xf32>
    %114 = arith.addf %113, %112 : vector<2x128xf32>
    %115 = arith.divf %113, %114 : vector<2x128xf32>
    %116 = arith.mulf %107, %90 : vector<2x128xf32>
    %117 = arith.mulf %101, %109 : vector<2x128xf32>
    %118 = arith.addf %116, %117 : vector<2x128xf32>
    %119 = math.tanh %118 : vector<2x128xf32>
    %120 = arith.mulf %115, %119 : vector<2x128xf32>
    %121 = vector.extract_strided_slice %5 {offsets = [8, 0], sizes = [2, 512], strides = [1, 1]} : vector<16x512xf32> to vector<2x512xf32>
    %cst_25 = arith.constant dense<0.000000e+00> : vector<2x512xf32>
    %122 = tpu.matmul %120, %6, %cst_25 {dimension_numbers = #tpu.dot_dimension_numbers<[1], [0], [0], [1], [0, 0, 1, 1], [], []>} : vector<2x128xf32>, vector<128x512xf32>, vector<2x512xf32> -> vector<2x512xf32>
    %123 = arith.addf %121, %122 : vector<2x512xf32>
    %124 = vector.extract_strided_slice %123 {offsets = [0, 0], sizes = [2, 128], strides = [1, 1]} : vector<2x512xf32> to vector<2x128xf32>
    %125 = arith.negf %124 : vector<2x128xf32>
    %126 = math.exp %125 : vector<2x128xf32>
    %cst_26 = arith.constant 1.000000e+00 : f32
    %127 = vector.broadcast %cst_26 : f32 to vector<2x128xf32>
    %128 = arith.addf %127, %126 : vector<2x128xf32>
    %129 = arith.divf %127, %128 : vector<2x128xf32>
    %130 = vector.extract_strided_slice %123 {offsets = [0, 128], sizes = [2, 128], strides = [1, 1]} : vector<2x512xf32> to vector<2x128xf32>
    %131 = arith.negf %130 : vector<2x128xf32>
    %132 = math.exp %131 : vector<2x128xf32>
    %cst_27 = arith.constant 1.000000e+00 : f32
    %133 = vector.broadcast %cst_27 : f32 to vector<2x128xf32>
    %134 = arith.addf %133, %132 : vector<2x128xf32>
    %135 = arith.divf %133, %134 : vector<2x128xf32>
    %136 = vector.extract_strided_slice %123 {offsets = [0, 256], sizes = [2, 128], strides = [1, 1]} : vector<2x512xf32> to vector<2x128xf32>
    %137 = math.tanh %136 : vector<2x128xf32>
    %138 = vector.extract_strided_slice %123 {offsets = [0, 384], sizes = [2, 128], strides = [1, 1]} : vector<2x512xf32> to vector<2x128xf32>
    %139 = arith.negf %138 : vector<2x128xf32>
    %140 = math.exp %139 : vector<2x128xf32>
    %cst_28 = arith.constant 1.000000e+00 : f32
    %141 = vector.broadcast %cst_28 : f32 to vector<2x128xf32>
    %142 = arith.addf %141, %140 : vector<2x128xf32>
    %143 = arith.divf %141, %142 : vector<2x128xf32>
    %144 = arith.mulf %135, %118 : vector<2x128xf32>
    %145 = arith.mulf %129, %137 : vector<2x128xf32>
    %146 = arith.addf %144, %145 : vector<2x128xf32>
    %147 = math.tanh %146 : vector<2x128xf32>
    %148 = arith.mulf %143, %147 : vector<2x128xf32>
    %149 = vector.extract_strided_slice %5 {offsets = [10, 0], sizes = [2, 512], strides = [1, 1]} : vector<16x512xf32> to vector<2x512xf32>
    %cst_29 = arith.constant dense<0.000000e+00> : vector<2x512xf32>
    %150 = tpu.matmul %148, %6, %cst_29 {dimension_numbers = #tpu.dot_dimension_numbers<[1], [0], [0], [1], [0, 0, 1, 1], [], []>} : vector<2x128xf32>, vector<128x512xf32>, vector<2x512xf32> -> vector<2x512xf32>
    %151 = arith.addf %149, %150 : vector<2x512xf32>
    %152 = vector.extract_strided_slice %151 {offsets = [0, 0], sizes = [2, 128], strides = [1, 1]} : vector<2x512xf32> to vector<2x128xf32>
    %153 = arith.negf %152 : vector<2x128xf32>
    %154 = math.exp %153 : vector<2x128xf32>
    %cst_30 = arith.constant 1.000000e+00 : f32
    %155 = vector.broadcast %cst_30 : f32 to vector<2x128xf32>
    %156 = arith.addf %155, %154 : vector<2x128xf32>
    %157 = arith.divf %155, %156 : vector<2x128xf32>
    %158 = vector.extract_strided_slice %151 {offsets = [0, 128], sizes = [2, 128], strides = [1, 1]} : vector<2x512xf32> to vector<2x128xf32>
    %159 = arith.negf %158 : vector<2x128xf32>
    %160 = math.exp %159 : vector<2x128xf32>
    %cst_31 = arith.constant 1.000000e+00 : f32
    %161 = vector.broadcast %cst_31 : f32 to vector<2x128xf32>
    %162 = arith.addf %161, %160 : vector<2x128xf32>
    %163 = arith.divf %161, %162 : vector<2x128xf32>
    %164 = vector.extract_strided_slice %151 {offsets = [0, 256], sizes = [2, 128], strides = [1, 1]} : vector<2x512xf32> to vector<2x128xf32>
    %165 = math.tanh %164 : vector<2x128xf32>
    %166 = vector.extract_strided_slice %151 {offsets = [0, 384], sizes = [2, 128], strides = [1, 1]} : vector<2x512xf32> to vector<2x128xf32>
    %167 = arith.negf %166 : vector<2x128xf32>
    %168 = math.exp %167 : vector<2x128xf32>
    %cst_32 = arith.constant 1.000000e+00 : f32
    %169 = vector.broadcast %cst_32 : f32 to vector<2x128xf32>
    %170 = arith.addf %169, %168 : vector<2x128xf32>
    %171 = arith.divf %169, %170 : vector<2x128xf32>
    %172 = arith.mulf %163, %146 : vector<2x128xf32>
    %173 = arith.mulf %157, %165 : vector<2x128xf32>
    %174 = arith.addf %172, %173 : vector<2x128xf32>
    %175 = math.tanh %174 : vector<2x128xf32>
    %176 = arith.mulf %171, %175 : vector<2x128xf32>
    %177 = vector.extract_strided_slice %5 {offsets = [12, 0], sizes = [2, 512], strides = [1, 1]} : vector<16x512xf32> to vector<2x512xf32>
    %cst_33 = arith.constant dense<0.000000e+00> : vector<2x512xf32>
    %178 = tpu.matmul %176, %6, %cst_33 {dimension_numbers = #tpu.dot_dimension_numbers<[1], [0], [0], [1], [0, 0, 1, 1], [], []>} : vector<2x128xf32>, vector<128x512xf32>, vector<2x512xf32> -> vector<2x512xf32>
    %179 = arith.addf %177, %178 : vector<2x512xf32>
    %180 = vector.extract_strided_slice %179 {offsets = [0, 0], sizes = [2, 128], strides = [1, 1]} : vector<2x512xf32> to vector<2x128xf32>
    %181 = arith.negf %180 : vector<2x128xf32>
    %182 = math.exp %181 : vector<2x128xf32>
    %cst_34 = arith.constant 1.000000e+00 : f32
    %183 = vector.broadcast %cst_34 : f32 to vector<2x128xf32>
    %184 = arith.addf %183, %182 : vector<2x128xf32>
    %185 = arith.divf %183, %184 : vector<2x128xf32>
    %186 = vector.extract_strided_slice %179 {offsets = [0, 128], sizes = [2, 128], strides = [1, 1]} : vector<2x512xf32> to vector<2x128xf32>
    %187 = arith.negf %186 : vector<2x128xf32>
    %188 = math.exp %187 : vector<2x128xf32>
    %cst_35 = arith.constant 1.000000e+00 : f32
    %189 = vector.broadcast %cst_35 : f32 to vector<2x128xf32>
    %190 = arith.addf %189, %188 : vector<2x128xf32>
    %191 = arith.divf %189, %190 : vector<2x128xf32>
    %192 = vector.extract_strided_slice %179 {offsets = [0, 256], sizes = [2, 128], strides = [1, 1]} : vector<2x512xf32> to vector<2x128xf32>
    %193 = math.tanh %192 : vector<2x128xf32>
    %194 = vector.extract_strided_slice %179 {offsets = [0, 384], sizes = [2, 128], strides = [1, 1]} : vector<2x512xf32> to vector<2x128xf32>
    %195 = arith.negf %194 : vector<2x128xf32>
    %196 = math.exp %195 : vector<2x128xf32>
    %cst_36 = arith.constant 1.000000e+00 : f32
    %197 = vector.broadcast %cst_36 : f32 to vector<2x128xf32>
    %198 = arith.addf %197, %196 : vector<2x128xf32>
    %199 = arith.divf %197, %198 : vector<2x128xf32>
    %200 = arith.mulf %191, %174 : vector<2x128xf32>
    %201 = arith.mulf %185, %193 : vector<2x128xf32>
    %202 = arith.addf %200, %201 : vector<2x128xf32>
    %203 = math.tanh %202 : vector<2x128xf32>
    %204 = arith.mulf %199, %203 : vector<2x128xf32>
    %205 = vector.extract_strided_slice %5 {offsets = [14, 0], sizes = [2, 512], strides = [1, 1]} : vector<16x512xf32> to vector<2x512xf32>
    %cst_37 = arith.constant dense<0.000000e+00> : vector<2x512xf32>
    %206 = tpu.matmul %204, %6, %cst_37 {dimension_numbers = #tpu.dot_dimension_numbers<[1], [0], [0], [1], [0, 0, 1, 1], [], []>} : vector<2x128xf32>, vector<128x512xf32>, vector<2x512xf32> -> vector<2x512xf32>
    %207 = arith.addf %205, %206 : vector<2x512xf32>
    %208 = vector.extract_strided_slice %207 {offsets = [0, 0], sizes = [2, 128], strides = [1, 1]} : vector<2x512xf32> to vector<2x128xf32>
    %209 = arith.negf %208 : vector<2x128xf32>
    %210 = math.exp %209 : vector<2x128xf32>
    %cst_38 = arith.constant 1.000000e+00 : f32
    %211 = vector.broadcast %cst_38 : f32 to vector<2x128xf32>
    %212 = arith.addf %211, %210 : vector<2x128xf32>
    %213 = arith.divf %211, %212 : vector<2x128xf32>
    %214 = vector.extract_strided_slice %207 {offsets = [0, 128], sizes = [2, 128], strides = [1, 1]} : vector<2x512xf32> to vector<2x128xf32>
    %215 = arith.negf %214 : vector<2x128xf32>
    %216 = math.exp %215 : vector<2x128xf32>
    %cst_39 = arith.constant 1.000000e+00 : f32
    %217 = vector.broadcast %cst_39 : f32 to vector<2x128xf32>
    %218 = arith.addf %217, %216 : vector<2x128xf32>
    %219 = arith.divf %217, %218 : vector<2x128xf32>
    %220 = vector.extract_strided_slice %207 {offsets = [0, 256], sizes = [2, 128], strides = [1, 1]} : vector<2x512xf32> to vector<2x128xf32>
    %221 = math.tanh %220 : vector<2x128xf32>
    %222 = vector.extract_strided_slice %207 {offsets = [0, 384], sizes = [2, 128], strides = [1, 1]} : vector<2x512xf32> to vector<2x128xf32>
    %223 = arith.negf %222 : vector<2x128xf32>
    %224 = math.exp %223 : vector<2x128xf32>
    %cst_40 = arith.constant 1.000000e+00 : f32
    %225 = vector.broadcast %cst_40 : f32 to vector<2x128xf32>
    %226 = arith.addf %225, %224 : vector<2x128xf32>
    %227 = arith.divf %225, %226 : vector<2x128xf32>
    %228 = arith.mulf %219, %202 : vector<2x128xf32>
    %229 = arith.mulf %213, %221 : vector<2x128xf32>
    %230 = arith.addf %228, %229 : vector<2x128xf32>
    %231 = math.tanh %230 : vector<2x128xf32>
    %232 = arith.mulf %227, %231 : vector<2x128xf32>
    %c0_41 = arith.constant 0 : index
    %c0_42 = arith.constant 0 : index
    %233 = vector.load %arg5[%c0_41, %c0_42] : memref<128x128xf32, #tpu.memory_space<vmem>>, vector<128x128xf32>
    %cst_43 = arith.constant dense<0.000000e+00> : vector<2x128xf32>
    %234 = tpu.matmul %232, %233, %cst_43 {dimension_numbers = #tpu.dot_dimension_numbers<[1], [0], [0], [1], [0, 0, 1, 1], [], []>} : vector<2x128xf32>, vector<128x128xf32>, vector<2x128xf32> -> vector<2x128xf32>
    %c0_44 = arith.constant 0 : index
    %c0_45 = arith.constant 0 : index
    %235 = vector.load %arg6[%c0_44, %c0_45] : memref<1x128xf32, #tpu.memory_space<vmem>>, vector<1x128xf32>
    %236 = vector.broadcast %235 : vector<1x128xf32> to vector<2x128xf32>
    %237 = arith.addf %234, %236 : vector<2x128xf32>
    %c0_46 = arith.constant 0 : index
    %c0_47 = arith.constant 0 : index
    %238 = vector.load %arg1[%c0_46, %c0_47] : memref<2x16xf32, #tpu.memory_space<vmem>>, vector<2x16xf32>
    %c0_48 = arith.constant 0 : index
    %c0_49 = arith.constant 0 : index
    %239 = vector.load %arg7[%c0_48, %c0_49] : memref<16x64xf32, #tpu.memory_space<vmem>>, vector<16x64xf32>
    %cst_50 = arith.constant dense<0.000000e+00> : vector<2x64xf32>
    %240 = tpu.matmul %238, %239, %cst_50 {dimension_numbers = #tpu.dot_dimension_numbers<[1], [0], [0], [1], [0, 0, 1, 1], [], []>} : vector<2x16xf32>, vector<16x64xf32>, vector<2x64xf32> -> vector<2x64xf32>
    %c0_51 = arith.constant 0 : index
    %c0_52 = arith.constant 0 : index
    %241 = vector.load %arg8[%c0_51, %c0_52] : memref<1x64xf32, #tpu.memory_space<vmem>>, vector<1x64xf32>
    %242 = vector.broadcast %241 : vector<1x64xf32> to vector<2x64xf32>
    %243 = arith.addf %240, %242 : vector<2x64xf32>
    %cst_53 = arith.constant 0.000000e+00 : f32
    %244 = vector.broadcast %cst_53 : f32 to vector<2x64xf32>
    %245 = arith.maximumf %243, %244 : vector<2x64xf32>
    %c0_54 = arith.constant 0 : index
    %c0_55 = arith.constant 0 : index
    %246 = vector.load %arg9[%c0_54, %c0_55] : memref<64x128xf32, #tpu.memory_space<vmem>>, vector<64x128xf32>
    %cst_56 = arith.constant dense<0.000000e+00> : vector<2x128xf32>
    %247 = tpu.matmul %245, %246, %cst_56 {dimension_numbers = #tpu.dot_dimension_numbers<[1], [0], [0], [1], [0, 0, 1, 1], [], []>} : vector<2x64xf32>, vector<64x128xf32>, vector<2x128xf32> -> vector<2x128xf32>
    %c0_57 = arith.constant 0 : index
    %c0_58 = arith.constant 0 : index
    %248 = vector.load %arg10[%c0_57, %c0_58] : memref<1x128xf32, #tpu.memory_space<vmem>>, vector<1x128xf32>
    %249 = vector.broadcast %248 : vector<1x128xf32> to vector<2x128xf32>
    %250 = arith.addf %247, %249 : vector<2x128xf32>
    %cst_59 = arith.constant 0.000000e+00 : f32
    %251 = vector.broadcast %cst_59 : f32 to vector<2x128xf32>
    %252 = arith.maximumf %250, %251 : vector<2x128xf32>
    %c0_60 = arith.constant 0 : index
    %c0_61 = arith.constant 0 : index
    %253 = vector.load %arg11[%c0_60, %c0_61] : memref<128x128xf32, #tpu.memory_space<vmem>>, vector<128x128xf32>
    %cst_62 = arith.constant dense<0.000000e+00> : vector<2x128xf32>
    %254 = tpu.matmul %237, %253, %cst_62 {dimension_numbers = #tpu.dot_dimension_numbers<[1], [0], [0], [1], [0, 0, 1, 1], [], []>} : vector<2x128xf32>, vector<128x128xf32>, vector<2x128xf32> -> vector<2x128xf32>
    %c0_63 = arith.constant 0 : index
    %c0_64 = arith.constant 0 : index
    %255 = vector.load %arg12[%c0_63, %c0_64] : memref<128x128xf32, #tpu.memory_space<vmem>>, vector<128x128xf32>
    %cst_65 = arith.constant dense<0.000000e+00> : vector<2x128xf32>
    %256 = tpu.matmul %252, %255, %cst_65 {dimension_numbers = #tpu.dot_dimension_numbers<[1], [0], [0], [1], [0, 0, 1, 1], [], []>} : vector<2x128xf32>, vector<128x128xf32>, vector<2x128xf32> -> vector<2x128xf32>
    %257 = arith.addf %254, %256 : vector<2x128xf32>
    %c0_66 = arith.constant 0 : index
    %c0_67 = arith.constant 0 : index
    %258 = vector.load %arg13[%c0_66, %c0_67] : memref<1x128xf32, #tpu.memory_space<vmem>>, vector<1x128xf32>
    %259 = vector.broadcast %258 : vector<1x128xf32> to vector<2x128xf32>
    %260 = arith.addf %257, %259 : vector<2x128xf32>
    %cst_68 = arith.constant 0.000000e+00 : f32
    %261 = vector.broadcast %cst_68 : f32 to vector<2x128xf32>
    %262 = arith.maximumf %260, %261 : vector<2x128xf32>
    %c0_69 = arith.constant 0 : index
    %c0_70 = arith.constant 0 : index
    %263 = vector.load %arg14[%c0_69, %c0_70] : memref<128x128xf32, #tpu.memory_space<vmem>>, vector<128x128xf32>
    %cst_71 = arith.constant dense<0.000000e+00> : vector<2x128xf32>
    %264 = tpu.matmul %262, %263, %cst_71 {dimension_numbers = #tpu.dot_dimension_numbers<[1], [0], [0], [1], [0, 0, 1, 1], [], []>} : vector<2x128xf32>, vector<128x128xf32>, vector<2x128xf32> -> vector<2x128xf32>
    %c0_72 = arith.constant 0 : index
    %c0_73 = arith.constant 0 : index
    %265 = vector.load %arg15[%c0_72, %c0_73] : memref<1x128xf32, #tpu.memory_space<vmem>>, vector<1x128xf32>
    %266 = vector.broadcast %265 : vector<1x128xf32> to vector<2x128xf32>
    %267 = arith.addf %264, %266 : vector<2x128xf32>
    %c0_74 = arith.constant 0 : index
    %c0_75 = arith.constant 0 : index
    %268 = vector.load %arg16[%c0_74, %c0_75] : memref<2x128xf32, #tpu.memory_space<vmem>>, vector<2x128xf32>
    tpu.vector_store %arg16[%c0_74, %c0_75], %267 {strides = array<i32>} : memref<2x128xf32, #tpu.memory_space<vmem>>, vector<2x128xf32>,
    return
  }
}

</mosaic_0001>

<bundles_post_ra>
// kernel: hybrid_rnn_forward.1
= control target key start
LH: loop header
LB: loop body
LE: loop exit
PB: predicated region body
PF: predicated region fallthrough
CT: control target
= control target key end

     0   :  { %s4784_s0 = inlined_call_operand.vmem [shape: f32[16,128], index: 0, kind: input, shape index: {}]   ;;  %s4785_s1 = inlined_call_operand.vmem [shape: f32[2,16], index: 1, kind: input, shape index: {}]   ;;  %s4786_s2 = inlined_call_operand.hbm [shape: f32[128,512], index: 2, kind: input, shape index: {}]   ;;  %s4787_s3 = inlined_call_operand.hbm [shape: f32[128,512], index: 3, kind: input, shape index: {}]   ;;  %s4788_s4 = inlined_call_operand.hbm [shape: f32[1,512], index: 4, kind: input, shape index: {}]   ;;  %s4789_s5 = inlined_call_operand.vmem [shape: f32[128,128], index: 5, kind: input, shape index: {}]   ;;  %s4790_s6 = inlined_call_operand.vmem [shape: f32[1,128], index: 6, kind: input, shape index: {}]   ;;  %s4791_s7 = inlined_call_operand.hbm [shape: f32[16,64], index: 7, kind: input, shape index: {}]   ;;  %s4792_s8 = inlined_call_operand.hbm [shape: f32[1,64], index: 8, kind: input, shape index: {}]   ;;  %s4793_s9 = inlined_call_operand.hbm [shape: f32[64,128], index: 9, kind: input, shape index: {}]   ;;  %s4794_s10 = inlined_call_operand.hbm [shape: f32[1,128], index: 10, kind: input, shape index: {}]   ;;  %s4795_s11 = inlined_call_operand.vmem [shape: f32[128,128], index: 11, kind: input, shape index: {}]   ;;  %s4796_s12 = inlined_call_operand.hbm [shape: f32[128,128], index: 12, kind: input, shape index: {}]   ;;  %s4797_s13 = inlined_call_operand.hbm [shape: f32[1,128], index: 13, kind: input, shape index: {}]   ;;  %s4798_s14 = inlined_call_operand.hbm [shape: f32[128,128], index: 14, kind: input, shape index: {}]   ;;  %s4799_s15 = inlined_call_operand.hbm [shape: f32[1,128], index: 15, kind: input, shape index: {}]   ;;  %s4800_s16 = inlined_call_operand.hbm [shape: f32[2,128], index: 16, kind: output, shape index: {}]  }
   0x1   :  { %4804 = sst [smem:[#allocation28_spill]] %s4784_s0 }
   0x2   :  { %21 = vsyncpa [#allocation3], 0 }
   0x3   :  { %22 = vsyncpa [#allocation6], 0 }
   0x4   :  { %23 = vsyncpa [#allocation9], 0 }
   0x5   :  { %24 = vsyncpa [#allocation12], 0 }
   0x6   :  { %25 = vsyncpa [#allocation15], 0 }
   0x7   :  { %26 = vsyncpa [#allocation18], 0 }
   0x8   :  { %27 = vsyncpa [#allocation4], 0  ;;  %s3922_s21 = smov [#allocation5]   ;;  %s3923_s23 = smov [#allocation8]  }
   0x9   :  { %s49_s22 = sshll.u32 %s3922_s21, 4  ;;  %s75_s24 = sshll.u32 %s3923_s23, 4  ;;  %s50_s22 = int_to_ptr.vmem [resolvable:$true] %s49_s22  ;;  %s4026_s24 = int_to_ptr.vmem [resolvable:$true] %s75_s24 }
   0xa   :  { %s3644_s27 = scalar_lea.hbm %s4787_s3, 8192 }
   0xb   :  { %p3645_p0 = scmp.ne.s32.totalorder %s4787_s3, %s3644_s27  ;;  %p3648_p1 = scmp.lt.u32.totalorder %s3644_s27, %s4787_s3 }
   0xd   :  { %p3650_p2 = pnand %p3648_p1, %p3645_p0 }
   0xf   :  { %3653 = shalt.err (!%p3650_p2)
}
  0x10   :  { %s3654_s17 = scalar_lea.vmem %s50_s22, 8192  ;;  %p3659_p4 = scmp.lt.s32.totalorder %s50_s22, %s50_s22 }
  0x11   :  { %p3655_p3 = scmp.ne.s32.totalorder %s50_s22, %s3654_s17  ;;  %p3660_p5 = scmp.lt.s32.totalorder %s3654_s17, %s3654_s17 }
  0x13   :  { %p3661_p6 = por %p3660_p5, %p3659_p4 }
  0x15   :  { %p3662_p7 = pnand %p3661_p6, %p3655_p3 }
  0x17   :  { %3665 = shalt.err (!%p3662_p7)
}
  0x18   :  { %s4802_s18 = smov 512   ;;  %s4803_s19 = smov 32  }
  0x19   :  { %55 = dma.hbm_to_vmem [thread:$0]  %s4787_s3, 8192, %s50_s22, [#allocation6], %s4802_s18, %s4802_s18, %s4803_s19  }
  0x1a   :  { %s3666_s26 = scalar_lea.hbm %s4791_s7, 256 }
  0x1b   :  { %p3667_p8 = scmp.ne.s32.totalorder %s4791_s7, %s3666_s26  ;;  %p3670_p9 = scmp.lt.u32.totalorder %s3666_s26, %s4791_s7 }
  0x1d   :  { %p3672_p10 = pnand %p3670_p9, %p3667_p8 }
  0x1f   :  { %3675 = shalt.err (!%p3672_p10)
}
  0x20   :  { %s3676_s0 = scalar_lea.vmem %s4026_s24, 256  ;;  %p3681_p12 = scmp.lt.s32.totalorder %s4026_s24, %s4026_s24 }
  0x21   :  { %p3677_p11 = scmp.ne.s32.totalorder %s4026_s24, %s3676_s0  ;;  %p3682_p13 = scmp.lt.s32.totalorder %s3676_s0, %s3676_s0 }
  0x23   :  { %p3683_p0 = por %p3682_p13, %p3681_p12 }
  0x25   :  { %p3684_p1 = pnand %p3683_p0, %p3677_p11 }
  0x27   :  { %3687 = shalt.err (!%p3684_p1)
}
  0x28   :  { %s3926_s3 = smov 128   ;;  %s3927_s22 = smov 8  }
  0x29   :  { %81 = dma.hbm_to_vmem [thread:$0]  %s4791_s7, 256, %s4026_s24, [#allocation9], %s3926_s3, %s3926_s3, %s3927_s22  }
  0x2a   :  { %s3928_s21 = smov [#allocation11]   ;;  %s3929_s25 = smov [#allocation14]  }
  0x2b   :  { %s97_s23 = sshll.u32 %s3928_s21, 4  ;;  %s121_s26 = sshll.u32 %s3929_s25, 4  ;;  %s98_s23 = int_to_ptr.vmem [resolvable:$true] %s97_s23  ;;  %s4063_s26 = int_to_ptr.vmem [resolvable:$true] %s121_s26 }
  0x2c   :  { %s3688_s29 = scalar_lea.hbm %s4793_s9, 1024 }
  0x2d   :  { %p3689_p2 = scmp.ne.s32.totalorder %s4793_s9, %s3688_s29  ;;  %p3692_p3 = scmp.lt.u32.totalorder %s3688_s29, %s4793_s9 }
  0x2f   :  { %p3694_p4 = pnand %p3692_p3, %p3689_p2 }
  0x31   :  { %3697 = shalt.err (!%p3694_p4)
}
  0x32   :  { %s3698_s7 = scalar_lea.vmem %s98_s23, 1024  ;;  %p3703_p6 = scmp.lt.s32.totalorder %s98_s23, %s98_s23 }
  0x33   :  { %p3699_p5 = scmp.ne.s32.totalorder %s98_s23, %s3698_s7  ;;  %p3704_p7 = scmp.lt.s32.totalorder %s3698_s7, %s3698_s7 }
  0x35   :  { %p3705_p8 = por %p3704_p7, %p3703_p6 }
  0x37   :  { %p3706_p9 = pnand %p3705_p8, %p3699_p5 }
  0x39   :  { %3709 = shalt.err (!%p3706_p9)
}
  0x3a   :  { %103 = dma.hbm_to_vmem [thread:$0]  %s4793_s9, 1024, %s98_s23, [#allocation12], %s3926_s3, %s3926_s3, %s3927_s22  }
  0x3b   :  { %s3710_s18 = scalar_lea.hbm %s4796_s12, 2048 }
  0x3c   :  { %p3711_p10 = scmp.ne.s32.totalorder %s4796_s12, %s3710_s18  ;;  %p3714_p11 = scmp.lt.u32.totalorder %s3710_s18, %s4796_s12 }
  0x3e   :  { %p3716_p12 = pnand %p3714_p11, %p3711_p10 }
  0x40   :  { %3719 = shalt.err (!%p3716_p12)
}
  0x41   :  { %s3720_s29 = scalar_lea.vmem %s4063_s26, 2048  ;;  %p3725_p0 = scmp.lt.s32.totalorder %s4063_s26, %s4063_s26 }
  0x42   :  { %p3721_p13 = scmp.ne.s32.totalorder %s4063_s26, %s3720_s29  ;;  %p3726_p1 = scmp.lt.s32.totalorder %s3720_s29, %s3720_s29 }
  0x44   :  { %p3727_p2 = por %p3726_p1, %p3725_p0 }
  0x46   :  { %p3728_p3 = pnand %p3727_p2, %p3721_p13 }
  0x48   :  { %3731 = shalt.err (!%p3728_p3)
}
  0x49   :  { %127 = dma.hbm_to_vmem [thread:$0]  %s4796_s12, 2048, %s4063_s26, [#allocation15], %s3926_s3, %s3926_s3, %s3927_s22  }
  0x4a   :  { %s3930_s30 = smov [#allocation17]   ;;  %s3931_s7 = smov [#allocation2]  }
  0x4b   :  { %s143_s0 = sshll.u32 %s3930_s30, 4  ;;  %s37_s24 = sshll.u32 %s3931_s7, 4  ;;  %s144_s0 = int_to_ptr.vmem [resolvable:$true] %s143_s0  ;;  %s4100_s24 = int_to_ptr.vmem [resolvable:$true] %s37_s24 }
  0x4c   :  { %s3732_s21 = scalar_lea.hbm %s4798_s14, 2048 }
  0x4d   :  { %p3733_p4 = scmp.ne.s32.totalorder %s4798_s14, %s3732_s21  ;;  %p3736_p5 = scmp.lt.u32.totalorder %s3732_s21, %s4798_s14 }
  0x4f   :  { %p3738_p6 = pnand %p3736_p5, %p3733_p4 }
  0x51   :  { %3741 = shalt.err (!%p3738_p6)
}
  0x52   :  { %s3742_s12 = scalar_lea.vmem %s144_s0, 2048  ;;  %p3747_p8 = scmp.lt.s32.totalorder %s144_s0, %s144_s0 }
  0x53   :  { %p3743_p7 = scmp.ne.s32.totalorder %s144_s0, %s3742_s12  ;;  %p3748_p9 = scmp.lt.s32.totalorder %s3742_s12, %s3742_s12 }
  0x55   :  { %p3749_p10 = por %p3748_p9, %p3747_p8 }
  0x57   :  { %p3750_p11 = pnand %p3749_p10, %p3743_p7 }
  0x59   :  { %3753 = shalt.err (!%p3750_p11)
}
  0x5a   :  { %149 = dma.hbm_to_vmem [thread:$0]  %s4798_s14, 2048, %s144_s0, [#allocation18], %s3926_s3, %s3926_s3, %s3927_s22  }
  0x5b   :  { %s3754_s23 = scalar_lea.hbm %s4786_s2, 8192 }
  0x5c   :  { %p3755_p12 = scmp.ne.s32.totalorder %s4786_s2, %s3754_s23  ;;  %p3758_p13 = scmp.lt.u32.totalorder %s3754_s23, %s4786_s2 }
  0x5e   :  { %p3760_p0 = pnand %p3758_p13, %p3755_p12 }
  0x60   :  { %3763 = shalt.err (!%p3760_p0)
}
  0x61   :  { %s3764_s21 = scalar_lea.vmem %s4100_s24, 8192  ;;  %p3769_p2 = scmp.lt.s32.totalorder %s4100_s24, %s4100_s24 }
  0x62   :  { %p3765_p1 = scmp.ne.s32.totalorder %s4100_s24, %s3764_s21  ;;  %p3770_p3 = scmp.lt.s32.totalorder %s3764_s21, %s3764_s21 }
  0x64   :  { %p3771_p4 = por %p3770_p3, %p3769_p2 }
  0x66   :  { %p3772_p5 = pnand %p3771_p4, %p3765_p1 }
  0x68   :  { %3775 = shalt.err (!%p3772_p5)
}
  0x69   :  { %s4805_s14 = smov 32   ;;  %s4806_s3 = smov 512  }
  0x6a   :  { %43 = dma.hbm_to_vmem [thread:$0]  %s4786_s2, 8192, %s4100_s24, [#allocation3], %s4806_s3, %s4806_s3, %s4805_s14  }
  0x6b   :  { %s3932_s18 = smov [#allocation7]   ;;  %s3933_s25 = smov [#allocation10]  }
  0x6c   :  { %s62_s19 = sshll.u32 %s3932_s18, 4  ;;  %s88_s27 = sshll.u32 %s3933_s25, 4  ;;  %s63_s19 = int_to_ptr.vmem [resolvable:$true] %s62_s19  ;;  %s89_s27 = int_to_ptr.vmem [resolvable:$true] %s88_s27 }
  0x6d   :  { %s3776_s28 = scalar_lea.hbm %s4788_s4, 64 }
  0x6e   :  { %p3777_p6 = scmp.ne.s32.totalorder %s4788_s4, %s3776_s28  ;;  %p3780_p7 = scmp.lt.u32.totalorder %s3776_s28, %s4788_s4 }
  0x70   :  { %p3782_p8 = pnand %p3780_p7, %p3777_p6 }
  0x72   :  { %3785 = shalt.err (!%p3782_p8)
}
  0x73   :  { %s3786_s2 = scalar_lea.vmem %s63_s19, 64  ;;  %p3791_p10 = scmp.lt.s32.totalorder %s63_s19, %s63_s19 }
  0x74   :  { %p3787_p9 = scmp.ne.s32.totalorder %s63_s19, %s3786_s2  ;;  %p3792_p11 = scmp.lt.s32.totalorder %s3786_s2, %s3786_s2 }
  0x76   :  { %p3793_p12 = por %p3792_p11, %p3791_p10 }
  0x78   :  { %p3794_p13 = pnand %p3793_p12, %p3787_p9 }
  0x7a   :  { %3797 = shalt.err (!%p3794_p13)
}
  0x7b   :  { %65 = dma.hbm_to_vmem [thread:$0]  %s4788_s4, 64, %s63_s19, [#allocation6]  }
  0x7c   :  { %s3798_s21 = scalar_lea.hbm %s4792_s8, 16 }
  0x7d   :  { %p3799_p0 = scmp.ne.s32.totalorder %s4792_s8, %s3798_s21  ;;  %p3802_p1 = scmp.lt.u32.totalorder %s3798_s21, %s4792_s8 }
  0x7f   :  { %p3804_p2 = pnand %p3802_p1, %p3799_p0 }
  0x81   :  { %3807 = shalt.err (!%p3804_p2)
}
  0x82   :  { %s3808_s18 = scalar_lea.vmem %s89_s27, 16  ;;  %s3812_s25 = scalar_lea.vmem %s89_s27, 32 }
  0x83   :  { %p3809_p3 = scmp.ne.s32.totalorder %s89_s27, %s3808_s18  ;;  %p3813_p4 = scmp.lt.s32.totalorder %s89_s27, %s89_s27 }
  0x84   :  { %p3814_p5 = scmp.lt.s32.totalorder %s3812_s25, %s3808_s18 }
  0x86   :  { %p3815_p6 = por %p3814_p5, %p3813_p4 }
  0x88   :  { %p3816_p7 = pnand %p3815_p6, %p3809_p3 }
  0x8a   :  { %3819 = shalt.err (!%p3816_p7)
}
  0x8b   :  { %91 = dma.hbm_to_vmem [thread:$0]  %s4792_s8, 16, %s89_s27, [#allocation9]  }
  0x8c   :  { %s3934_s12 = smov [#allocation13]   ;;  %s3935_s28 = smov [#allocation16]  }
  0x8d   :  { %s110_s26 = sshll.u32 %s3934_s12, 4  ;;  %s134_s29 = sshll.u32 %s3935_s28, 4  ;;  %s111_s26 = int_to_ptr.vmem [resolvable:$true] %s110_s26  ;;  %s135_s29 = int_to_ptr.vmem [resolvable:$true] %s134_s29 }
  0x8e   :  { %s3820_s30 = scalar_lea.hbm %s4794_s10, 16 }
  0x8f   :  { %p3821_p8 = scmp.ne.s32.totalorder %s4794_s10, %s3820_s30  ;;  %p3824_p9 = scmp.lt.u32.totalorder %s3820_s30, %s4794_s10 }
  0x91   :  { %p3826_p10 = pnand %p3824_p9, %p3821_p8 }
  0x93   :  { %3829 = shalt.err (!%p3826_p10)
}
  0x94   :  { %s3830_s8 = scalar_lea.vmem %s111_s26, 16  ;;  %s3834_s27 = scalar_lea.vmem %s111_s26, 32 }
  0x95   :  { %p3831_p11 = scmp.ne.s32.totalorder %s111_s26, %s3830_s8  ;;  %p3835_p12 = scmp.lt.s32.totalorder %s111_s26, %s111_s26 }
  0x96   :  { %p3836_p13 = scmp.lt.s32.totalorder %s3834_s27, %s3830_s8 }
  0x98   :  { %p3837_p0 = por %p3836_p13, %p3835_p12 }
  0x9a   :  { %p3838_p1 = pnand %p3837_p0, %p3831_p11 }
  0x9c   :  { %3841 = shalt.err (!%p3838_p1)
}
  0x9d   :  { %113 = dma.hbm_to_vmem [thread:$0]  %s4794_s10, 16, %s111_s26, [#allocation12]  }
  0x9e   :  { %s3842_s22 = scalar_lea.hbm %s4797_s13, 16 }
  0x9f   :  { %p3843_p2 = scmp.ne.s32.totalorder %s4797_s13, %s3842_s22  ;;  %p3846_p3 = scmp.lt.u32.totalorder %s3842_s22, %s4797_s13 }
  0xa1   :  { %p3848_p4 = pnand %p3846_p3, %p3843_p2 }
  0xa3   :  { %3851 = shalt.err (!%p3848_p4)
}
  0xa4   :  { %s3852_s19 = scalar_lea.vmem %s135_s29, 16  ;;  %s3856_s12 = scalar_lea.vmem %s135_s29, 32 }
  0xa5   :  { %p3853_p5 = scmp.ne.s32.totalorder %s135_s29, %s3852_s19  ;;  %p3857_p6 = scmp.lt.s32.totalorder %s135_s29, %s135_s29 }
  0xa6   :  { %p3858_p7 = scmp.lt.s32.totalorder %s3856_s12, %s3852_s19 }
  0xa8   :  { %p3859_p8 = por %p3858_p7, %p3857_p6 }
  0xaa   :  { %p3860_p9 = pnand %p3859_p8, %p3853_p5 }
  0xac   :  { %3863 = shalt.err (!%p3860_p9)
}
  0xad   :  { %137 = dma.hbm_to_vmem [thread:$0]  %s4797_s13, 16, %s135_s29, [#allocation15]  }
  0xae   :  { %s3936_s28 = smov [#allocation19]   ;;  %s3864_s2 = scalar_lea.hbm %s4799_s15, 16 }
  0xaf   :  { %s156_s9 = sshll.u32 %s3936_s28, 4  ;;  %p3865_p10 = scmp.ne.s32.totalorder %s4799_s15, %s3864_s2  ;;  %s157_s9 = int_to_ptr.vmem [resolvable:$true] %s156_s9 }
  0xb0   :  { %p3868_p11 = scmp.lt.u32.totalorder %s3864_s2, %s4799_s15 }
  0xb2   :  { %p3870_p12 = pnand %p3868_p11, %p3865_p10 }
  0xb4   :  { %3873 = shalt.err (!%p3870_p12)
}
  0xb5   :  { %s3874_s27 = scalar_lea.vmem %s157_s9, 16  ;;  %s3878_s13 = scalar_lea.vmem %s157_s9, 32 }
  0xb6   :  { %p3875_p13 = scmp.ne.s32.totalorder %s157_s9, %s3874_s27  ;;  %p3879_p0 = scmp.lt.s32.totalorder %s157_s9, %s157_s9 }
  0xb7   :  { %p3880_p1 = scmp.lt.s32.totalorder %s3878_s13, %s3874_s27 }
  0xb9   :  { %p3881_p2 = por %p3880_p1, %p3879_p0 }
  0xbb   :  { %p3882_p3 = pnand %p3881_p2, %p3875_p13 }
  0xbd   :  { %3885 = shalt.err (!%p3882_p3)
}
  0xbe   :  { %159 = dma.hbm_to_vmem [thread:$0]  %s4799_s15, 16, %s157_s9, [#allocation18]  }
  0xbf   :  { %3908 = dma.done.wait [#allocation3], 8192  }
  0xc0   :  { %3909 = vsyncadd [#allocation3], 4294959104 }
  0xc1   :  { %3910 = dma.done.wait [#allocation6], 8256  }
  0xc2   :  { %3911 = vsyncadd [#allocation6], 4294959040 }
  0xc3   :  { %3912 = dma.done.wait [#allocation9], 272  }
  0xc4   :  { %3913 = vsyncadd [#allocation9], 4294967024 }
  0xc5   :  { %3914 = dma.done.wait [#allocation12], 1040  }
  0xc6   :  { %3915 = vsyncadd [#allocation12], 4294966256 }
  0xc7   :  { %3916 = dma.done.wait [#allocation15], 2064  }
  0xc8   :  { %3917 = vsyncadd [#allocation15], 4294965232 }
  0xc9   :  { %3918 = dma.done.wait [#allocation18], 2064  }
  0xca   :  { %3919 = vsyncadd [#allocation18], 4294965232  ;;  %v3937_v0 = vmov 0.0   ;;  %v196_v1 = vld [vmem:[#allocation2 + $0x8] sm:$0xff]  ;;  %v198_v3 = vld [vmem:[#allocation2 + $0x18] sm:$0xff]  ;;  %s4807_s14 = sld [smem:[#allocation28_spill]] }
  0xcb   :  { %345 = vmatprep.mubr.f32.mxu0 %v3937_v0  ;;  %422 = vmatprep.mubr.f32.mxu1 %v3937_v0  ;;  %v200_v2 = vld [vmem:[#allocation2 + $0x28] sm:$0xff]  ;;  %v202_v5 = vld [vmem:[#allocation2 + $0x38] sm:$0xff]  ;;  %v195_v6 = vld [vmem:[#allocation2] sm:$0xff]  ;;  %vm3939_vm0 = vmmov 0   ;;  %vm2073_vm1 = vcmask 130048   ;;  %vm2163_vm2 = vcmask 523264  }
  0xcc   :  { %v2810_v4 = vpack.c.bf16 %v200_v2, %v196_v1  ;;  %v199_v7 = vld [vmem:[#allocation2 + $0x20] sm:$0xff]  ;;  %v2842_v8 = vpack.c.bf16 %v202_v5, %v198_v3  ;;  %v197_v10 = vld [vmem:[#allocation2 + $0x10] sm:$0xff]  ;;  %v204_v12 = vld [vmem:[#allocation2 + $0x48] sm:$0xff] }
  0xcd   :  { %v2812_v9 = vpack.c.bf16 %v199_v7, %v195_v6  ;;  %v201_v11 = vld [vmem:[#allocation2 + $0x30] sm:$0xff]  ;;  %v208_v14 = vld [vmem:[#allocation2 + $0x68] sm:$0xff]  ;;  %v206_v15 = vld [vmem:[#allocation2 + $0x58] sm:$0xff] }
  0xce   :  { %2811 = vmatprep.subr.bf16.mxu0 %v2810_v4  ;;  %v2844_v13 = vpack.c.bf16 %v201_v11, %v197_v10  ;;  %v210_v16 = vld [vmem:[#allocation2 + $0x78] sm:$0xff]  ;;  %2843 = vmatprep.subr.bf16.mxu1 %v2842_v8  ;;  %v2814_v17 = vpack.c.bf16 %v208_v14, %v204_v12  ;;  %v203_v19 = vld [vmem:[#allocation2 + $0x40] sm:$0xff]  ;;  %v205_v21 = vld [vmem:[#allocation2 + $0x50] sm:$0xff] }
  0xcf   :  { %2813 = vmatpush1.bf16.msra.mxu0 %v2812_v9  ;;  %v2846_v18 = vpack.c.bf16 %v210_v16, %v206_v15  ;;  %v207_v20 = vld [vmem:[#allocation2 + $0x60] sm:$0xff]  ;;  %v209_v23 = vld [vmem:[#allocation2 + $0x70] sm:$0xff]  ;;  %v212_v24 = vld [vmem:[#allocation2 + $0x88] sm:$0xff] }
  0xd0   :  { %2845 = vmatpush1.bf16.msra.mxu1 %v2844_v13  ;;  %v2816_v22 = vpack.c.bf16 %v207_v20, %v203_v19  ;;  %v216_v25 = vld [vmem:[#allocation2 + $0xa8] sm:$0xff]  ;;  %2815 = vmatprep.subr.bf16.mxu0 %v2814_v17  ;;  %v2848_v26 = vpack.c.bf16 %v209_v23, %v205_v21  ;;  %v214_v28 = vld [vmem:[#allocation2 + $0x98] sm:$0xff]  ;;  %v211_v30 = vld [vmem:[#allocation2 + $0x80] sm:$0xff] }
  0xd1   :  { %2847 = vmatprep.subr.bf16.mxu1 %v2846_v18  ;;  %v2818_v27 = vpack.c.bf16 %v216_v25, %v212_v24  ;;  %v218_v29 = vld [vmem:[#allocation2 + $0xb8] sm:$0xff]  ;;  %v215_v32 = vld [vmem:[#allocation2 + $0xa0] sm:$0xff]  ;;  %v213_v33 = vld [vmem:[#allocation2 + $0x90] sm:$0xff] }
  0xd2   :  { %v2850_v31 = vpack.c.bf16 %v218_v29, %v214_v28  ;;  %v217_v34 = vld [vmem:[#allocation2 + $0xb0] sm:$0xff]  ;;  %v2820_v35 = vpack.c.bf16 %v215_v32, %v211_v30  ;;  %v220_v36 = vld [vmem:[#allocation2 + $0xc8] sm:$0xff]  ;;  %v222_v38 = vld [vmem:[#allocation2 + $0xd8] sm:$0xff] }
  0xd3   :  { %2817 = vmatpush1.bf16.msra.mxu0 %v2816_v22  ;;  %v224_v37 = vld [vmem:[#allocation2 + $0xe8] sm:$0xff]  ;;  %v2852_v39 = vpack.c.bf16 %v217_v34, %v213_v33  ;;  %v226_v41 = vld [vmem:[#allocation2 + $0xf8] sm:$0xff]  ;;  %v219_v42 = vld [vmem:[#allocation2 + $0xc0] sm:$0xff] }
  0xd4   :  { %2849 = vmatpush1.bf16.msra.mxu1 %v2848_v26  ;;  %2819 = vmatprep.subr.bf16.mxu0 %v2818_v27  ;;  %v2822_v40 = vpack.c.bf16 %v224_v37, %v220_v36  ;;  %v223_v43 = vld [vmem:[#allocation2 + $0xe0] sm:$0xff]  ;;  %v2854_v44 = vpack.c.bf16 %v226_v41, %v222_v38  ;;  %v221_v45 = vld [vmem:[#allocation2 + $0xd0] sm:$0xff]  ;;  %v228_v47 = vld [vmem:[#allocation2 + $0x108] sm:$0xff] }
  0xd5   :  { %2851 = vmatprep.subr.bf16.mxu1 %v2850_v31  ;;  %v225_v46 = vld [vmem:[#allocation2 + $0xf0] sm:$0xff]  ;;  %v232_v48 = vld [vmem:[#allocation2 + $0x128] sm:$0xff]  ;;  %v230_v49 = vld [vmem:[#allocation2 + $0x118] sm:$0xff]  ;;  %v2824_v51 = vpack.c.bf16 %v223_v43, %v219_v42 }
  0xd6   :  { %v234_v50 = vld [vmem:[#allocation2 + $0x138] sm:$0xff]  ;;  %v2856_v52 = vpack.c.bf16 %v225_v46, %v221_v45  ;;  %v2826_v53 = vpack.c.bf16 %v232_v48, %v228_v47  ;;  %v227_v54 = vld [vmem:[#allocation2 + $0x100] sm:$0xff]  ;;  %v229_v56 = vld [vmem:[#allocation2 + $0x110] sm:$0xff] }
  0xd7   :  { %2821 = vmatpush1.bf16.msra.mxu0 %v2820_v35  ;;  %v231_v55 = vld [vmem:[#allocation2 + $0x120] sm:$0xff]  ;;  %v2858_v57 = vpack.c.bf16 %v234_v50, %v230_v49  ;;  %v233_v58 = vld [vmem:[#allocation2 + $0x130] sm:$0xff]  ;;  %v236_v59 = vld [vmem:[#allocation2 + $0x148] sm:$0xff] }
  0xd8   :  { %2853 = vmatpush1.bf16.msra.mxu1 %v2852_v39  ;;  %2823 = vmatprep.subr.bf16.mxu0 %v2822_v40  ;;  %v240_v60 = vld [vmem:[#allocation2 + $0x168] sm:$0xff]  ;;  %v238_v61 = vld [vmem:[#allocation2 + $0x158] sm:$0xff]  ;;  %v2828_v63 = vpack.c.bf16 %v231_v55, %v227_v54  ;;  %v2860_v1 = vpack.c.bf16 %v233_v58, %v229_v56  ;;  %v235_v3 = vld [vmem:[#allocation2 + $0x140] sm:$0xff] }
  0xd9   :  { %2855 = vmatprep.subr.bf16.mxu1 %v2854_v44  ;;  %v242_v62 = vld [vmem:[#allocation2 + $0x178] sm:$0xff]  ;;  %v2830_v2 = vpack.c.bf16 %v240_v60, %v236_v59  ;;  %v239_v4 = vld [vmem:[#allocation2 + $0x160] sm:$0xff]  ;;  %v237_v5 = vld [vmem:[#allocation2 + $0x150] sm:$0xff] }
  0xda   :  { %v2862_v6 = vpack.c.bf16 %v242_v62, %v238_v61  ;;  %v241_v7 = vld [vmem:[#allocation2 + $0x170] sm:$0xff]  ;;  %v244_v8 = vld [vmem:[#allocation2 + $0x188] sm:$0xff]  ;;  %v246_v10 = vld [vmem:[#allocation2 + $0x198] sm:$0xff]  ;;  %v2832_v12 = vpack.c.bf16 %v239_v4, %v235_v3 }
  0xdb   :  { %2825 = vmatpush1.bf16.msra.mxu0 %v2824_v51  ;;  %v248_v9 = vld [vmem:[#allocation2 + $0x1a8] sm:$0xff]  ;;  %v250_v11 = vld [vmem:[#allocation2 + $0x1b8] sm:$0xff]  ;;  %v2864_v13 = vpack.c.bf16 %v241_v7, %v237_v5  ;;  %v243_v15 = vld [vmem:[#allocation2 + $0x180] sm:$0xff] }
  0xdc   :  { %2857 = vmatpush1.bf16.msra.mxu1 %v2856_v52  ;;  %2827 = vmatprep.subr.bf16.mxu0 %v2826_v53  ;;  %v2834_v14 = vpack.c.bf16 %v248_v9, %v244_v8  ;;  %v247_v16 = vld [vmem:[#allocation2 + $0x1a0] sm:$0xff]  ;;  %v245_v17 = vld [vmem:[#allocation2 + $0x190] sm:$0xff]  ;;  %v2866_v18 = vpack.c.bf16 %v250_v11, %v246_v10  ;;  %v252_v20 = vld [vmem:[#allocation2 + $0x1c8] sm:$0xff] }
  0xdd   :  { %2859 = vmatprep.subr.bf16.mxu1 %v2858_v57  ;;  %v249_v19 = vld [vmem:[#allocation2 + $0x1b0] sm:$0xff]  ;;  %v256_v21 = vld [vmem:[#allocation2 + $0x1e8] sm:$0xff]  ;;  %v254_v22 = vld [vmem:[#allocation2 + $0x1d8] sm:$0xff]  ;;  %v2836_v24 = vpack.c.bf16 %v247_v16, %v243_v15 }
  0xde   :  { %v258_v23 = vld [vmem:[#allocation2 + $0x1f8] sm:$0xff]  ;;  %v2868_v25 = vpack.c.bf16 %v249_v19, %v245_v17  ;;  %v2838_v26 = vpack.c.bf16 %v256_v21, %v252_v20  ;;  %v251_v27 = vld [vmem:[#allocation2 + $0x1c0] sm:$0xff]  ;;  %v253_v29 = vld [vmem:[#allocation2 + $0x1d0] sm:$0xff] }
  0xdf   :  { %2829 = vmatpush1.bf16.msra.mxu0 %v2828_v63  ;;  %v255_v28 = vld [vmem:[#allocation2 + $0x1e0] sm:$0xff]  ;;  %v2870_v30 = vpack.c.bf16 %v258_v23, %v254_v22  ;;  %v257_v31 = vld [vmem:[#allocation2 + $0x1f0] sm:$0xff]  ;;  %v436_v32 = vld [vmem:[#allocation5 + $0x8] sm:$0xff] }
  0xe0   :  { %2861 = vmatpush1.bf16.msra.mxu1 %v2860_v1  ;;  %2831 = vmatprep.subr.bf16.mxu0 %v2830_v2  ;;  %v440_v33 = vld [vmem:[#allocation5 + $0x28] sm:$0xff]  ;;  %v438_v34 = vld [vmem:[#allocation5 + $0x18] sm:$0xff]  ;;  %v2840_v36 = vpack.c.bf16 %v255_v28, %v251_v27  ;;  %v2872_v37 = vpack.c.bf16 %v257_v31, %v253_v29  ;;  %v435_v39 = vld [vmem:[#allocation5] sm:$0xff] }
  0xe1   :  { %2863 = vmatprep.subr.bf16.mxu1 %v2862_v6  ;;  %v442_v35 = vld [vmem:[#allocation5 + $0x38] sm:$0xff]  ;;  %v4199_v38 = vpack.c.bf16 %v440_v33, %v436_v32  ;;  %v439_v40 = vld [vmem:[#allocation5 + $0x20] sm:$0xff]  ;;  %v437_v41 = vld [vmem:[#allocation5 + $0x10] sm:$0xff] }
  0xe2   :  { %v4201_v42 = vpack.c.bf16 %v442_v35, %v438_v34  ;;  %v441_v43 = vld [vmem:[#allocation5 + $0x30] sm:$0xff]  ;;  %v444_v44 = vld [vmem:[#allocation5 + $0x48] sm:$0xff]  ;;  %v446_v46 = vld [vmem:[#allocation5 + $0x58] sm:$0xff]  ;;  %v4206_v49 = vpack.c.bf16 %v439_v40, %v435_v39 }
  0xe3   :  { %2833 = vmatpush1.bf16.msra.mxu0 %v2832_v12  ;;  %v448_v45 = vld [vmem:[#allocation5 + $0x68] sm:$0xff]  ;;  %v450_v47 = vld [vmem:[#allocation5 + $0x78] sm:$0xff]  ;;  %v193_v48 = vld [vmem:[%s4807_s14] sm:$0xff]  ;;  %v4209_v50 = vpack.c.bf16 %v441_v43, %v437_v41 }
  0xe4   :  { %2865 = vmatpush1.bf16.msra.mxu1 %v2864_v13  ;;  %2835 = vmatprep.subr.bf16.mxu0 %v2834_v14  ;;  %v4211_v51 = vpack.c.bf16 %v448_v45, %v444_v44  ;;  %v443_v52 = vld [vmem:[#allocation5 + $0x40] sm:$0xff]  ;;  %v445_v54 = vld [vmem:[#allocation5 + $0x50] sm:$0xff]  ;;  %v4214_v55 = vpack.c.bf16 %v450_v47, %v446_v46  ;;  %v452_v57 = vld [vmem:[#allocation5 + $0x88] sm:$0xff] }
  0xe5   :  { %2867 = vmatprep.subr.bf16.mxu1 %v2866_v18  ;;  %v447_v53 = vld [vmem:[#allocation5 + $0x60] sm:$0xff]  ;;  %v449_v56 = vld [vmem:[#allocation5 + $0x70] sm:$0xff]  ;;  %v456_v58 = vld [vmem:[#allocation5 + $0xa8] sm:$0xff] }
  0xe6   :  { %v454_v59 = vld [vmem:[#allocation5 + $0x98] sm:$0xff]  ;;  %v4217_v61 = vpack.c.bf16 %v447_v53, %v443_v52  ;;  %v4221_v62 = vpack.c.bf16 %v449_v56, %v445_v54  ;;  %v4223_v63 = vpack.c.bf16 %v456_v58, %v452_v57  ;;  %v451_v1 = vld [vmem:[#allocation5 + $0x80] sm:$0xff]  ;;  %v453_v3 = vld [vmem:[#allocation5 + $0x90] sm:$0xff] }
  0xe7   :  { %2837 = vmatpush1.bf16.msra.mxu0 %v2836_v24  ;;  %v458_v60 = vld [vmem:[#allocation5 + $0xb8] sm:$0xff]  ;;  %v455_v2 = vld [vmem:[#allocation5 + $0xa0] sm:$0xff]  ;;  %v457_v5 = vld [vmem:[#allocation5 + $0xb0] sm:$0xff] }
  0xe8   :  { %2869 = vmatpush1.bf16.msra.mxu1 %v2868_v25  ;;  %2839 = vmatprep.subr.bf16.mxu0 %v2838_v26  ;;  %v4226_v4 = vpack.c.bf16 %v458_v60, %v454_v59  ;;  %v460_v6 = vld [vmem:[#allocation5 + $0xc8] sm:$0xff]  ;;  %v462_v8 = vld [vmem:[#allocation5 + $0xd8] sm:$0xff]  ;;  %v4231_v10 = vpack.c.bf16 %v455_v2, %v451_v1  ;;  %v4238_v12 = vpack.c.bf16 %v457_v5, %v453_v3  ;;  %v459_v14 = vld [vmem:[#allocation5 + $0xc0] sm:$0xff] }
  0xe9   :  { %2871 = vmatprep.subr.bf16.mxu1 %v2870_v30  ;;  %v464_v7 = vld [vmem:[#allocation5 + $0xe8] sm:$0xff]  ;;  %v466_v9 = vld [vmem:[#allocation5 + $0xf8] sm:$0xff]  ;;  %v463_v15 = vld [vmem:[#allocation5 + $0xe0] sm:$0xff] }
  0xea   :  { %v194_v11 = vld [vmem:[%s4807_s14 + $0x8] sm:$0xff]  ;;  %v4240_v13 = vpack.c.bf16 %v464_v7, %v460_v6  ;;  %v461_v16 = vld [vmem:[#allocation5 + $0xd0] sm:$0xff]  ;;  %v4243_v17 = vpack.c.bf16 %v466_v9, %v462_v8  ;;  %v470_v21 = vld [vmem:[#allocation5 + $0x118] sm:$0xff]  ;;  %v4247_v23 = vpack.c.bf16 %v463_v15, %v459_v14 }
  0xeb   :  { %2841 = vmatpush1.bf16.msra.mxu0 %v2840_v36  ;;  %v465_v18 = vld [vmem:[#allocation5 + $0xf0] sm:$0xff]  ;;  %v468_v19 = vld [vmem:[#allocation5 + $0x108] sm:$0xff]  ;;  %v474_v22 = vld [vmem:[#allocation5 + $0x138] sm:$0xff] }
  0xec   :  { %2873 = vmatpush1.bf16.msra.mxu1 %v2872_v37  ;;  %2875 = vmatprep.subr.bf16.mxu0 %v4199_v38  ;;  %v472_v20 = vld [vmem:[#allocation5 + $0x128] sm:$0xff]  ;;  %v4252_v24 = vpack.c.bf16 %v465_v18, %v461_v16  ;;  %v467_v26 = vld [vmem:[#allocation5 + $0x100] sm:$0xff]  ;;  %v469_v28 = vld [vmem:[#allocation5 + $0x110] sm:$0xff]  ;;  %v4257_v29 = vpack.c.bf16 %v474_v22, %v470_v21 }
  0xed   :  { %2907 = vmatprep.subr.bf16.mxu1 %v4201_v42  ;;  %v4254_v25 = vpack.c.bf16 %v472_v20, %v468_v19  ;;  %v471_v27 = vld [vmem:[#allocation5 + $0x120] sm:$0xff]  ;;  %v473_v30 = vld [vmem:[#allocation5 + $0x130] sm:$0xff]  ;;  %v476_v31 = vld [vmem:[#allocation5 + $0x148] sm:$0xff]  ;;  %v261_v20 = vlaneseq }
  0xee   :  { %346 = vmatmul.mubr.f32.vlgmr.msra.gmra.mrb[0].mxu0 %v193_v48  ;;  %v480_v32 = vld [vmem:[#allocation5 + $0x168] sm:$0xff]  ;;  %v478_v33 = vld [vmem:[#allocation5 + $0x158] sm:$0xff]  ;;  %v4260_v35 = vpack.c.bf16 %v471_v27, %v467_v26  ;;  %v4264_v36 = vpack.c.bf16 %v473_v30, %v469_v28  ;;  %v475_v39 = vld [vmem:[#allocation5 + $0x140] sm:$0xff] }
  0xef   :  { %423 = vmatmul.mubr.f32.vlgmr.msra.gmra.mrb[0].mxu1 %v193_v48  ;;  %2877 = vmatpush1.bf16.msra.mxu0 %v4206_v49  ;;  %v482_v34 = vld [vmem:[#allocation5 + $0x178] sm:$0xff]  ;;  %v4266_v37 = vpack.c.bf16 %v480_v32, %v476_v31  ;;  %v479_v40 = vld [vmem:[#allocation5 + $0x160] sm:$0xff]  ;;  %v477_v41 = vld [vmem:[#allocation5 + $0x150] sm:$0xff]  ;;  %v262_v21 = vshrl.u32 %v261_v20, 7 }
  0xf0   :  { %2909 = vmatpush1.bf16.msra.mxu1 %v4209_v50  ;;  %2879 = vmatprep.subr.bf16.mxu0 %v4211_v51  ;;  %v4269_v43 = vpack.c.bf16 %v482_v34, %v478_v33  ;;  %v481_v44 = vld [vmem:[#allocation5 + $0x170] sm:$0xff]  ;;  %v484_v45 = vld [vmem:[#allocation5 + $0x188] sm:$0xff]  ;;  %v486_v47 = vld [vmem:[#allocation5 + $0x198] sm:$0xff]  ;;  %v4272_v52 = vpack.c.bf16 %v479_v40, %v475_v39 }
  0xf1   :  { %2911 = vmatprep.subr.bf16.mxu1 %v4214_v55  ;;  %351 = vmatprep.mubr.f32.mxu0 %v3937_v0  ;;  %v488_v46 = vld [vmem:[#allocation5 + $0x1a8] sm:$0xff]  ;;  %v490_v48 = vld [vmem:[#allocation5 + $0x1b8] sm:$0xff]  ;;  %v4276_v53 = vpack.c.bf16 %v481_v44, %v477_v41  ;;  %v483_v56 = vld [vmem:[#allocation5 + $0x180] sm:$0xff]  ;;  %v263_v28 = vsub.s32 0, %v262_v21  ;;  %v267_v32 = vsub.s32 1, %v262_v21  ;;  %v271_v33 = vsub.s32 2, %v262_v21 }
  0xf2   :  { %428 = vmatprep.mubr.f32.mxu1 %v3937_v0  ;;  %352 = vmatmul.mubr.f32.gmra.mrb[2].mxu0 %v194_v11  ;;  %v4278_v54 = vpack.c.bf16 %v488_v46, %v484_v45  ;;  %v487_v57 = vld [vmem:[#allocation5 + $0x1a0] sm:$0xff]  ;;  %v485_v58 = vld [vmem:[#allocation5 + $0x190] sm:$0xff]  ;;  %v4281_v59 = vpack.c.bf16 %v490_v48, %v486_v47  ;;  %v492_v1 = vld [vmem:[#allocation5 + $0x1c8] sm:$0xff]  ;;  %v275_v34 = vsub.s32 3, %v262_v21 }
  0xf3   :  { %2881 = vmatpush1.bf16.msra.mxu0 %v4217_v61  ;;  %429 = vmatmul.mubr.f32.gmra.mrb[2].mxu1 %v194_v11  ;;  %v489_v60 = vld [vmem:[#allocation5 + $0x1b0] sm:$0xff]  ;;  %v496_v2 = vld [vmem:[#allocation5 + $0x1e8] sm:$0xff]  ;;  %v494_v3 = vld [vmem:[#allocation5 + $0x1d8] sm:$0xff]  ;;  %v4284_v6 = vpack.c.bf16 %v487_v57, %v483_v56 }
  0xf4   :  { %2913 = vmatpush1.bf16.msra.mxu1 %v4221_v62  ;;  %2883 = vmatprep.subr.bf16.mxu0 %v4223_v63  ;;  %v498_v5 = vld [vmem:[#allocation5 + $0x1f8] sm:$0xff]  ;;  %v4288_v7 = vpack.c.bf16 %v489_v60, %v485_v58  ;;  %v4290_v8 = vpack.c.bf16 %v496_v2, %v492_v1  ;;  %v491_v9 = vld [vmem:[#allocation5 + $0x1c0] sm:$0xff]  ;;  %v493_v15 = vld [vmem:[#allocation5 + $0x1d0] sm:$0xff] }
  0xf5   :  { %2915 = vmatprep.subr.bf16.mxu1 %v4226_v4  ;;  %563 = vmatprep.mubr.f32.mxu0 %v3937_v0  ;;  %v495_v11 = vld [vmem:[#allocation5 + $0x1e0] sm:$0xff]  ;;  %v4293_v14 = vpack.c.bf16 %v498_v5, %v494_v3  ;;  %v497_v16 = vld [vmem:[#allocation5 + $0x1f0] sm:$0xff] }
  0xf6   :  { %634 = vmatprep.mubr.f32.mxu1 %v3937_v0  ;;  %v4296_v18 = vpack.c.bf16 %v495_v11, %v491_v9  ;;  %v4300_v19 = vpack.c.bf16 %v497_v16, %v493_v15  ;;  %v259_v31 = vld [vmem:[#allocation7] sm:$0xf] }
  0xf7   :  { %2885 = vmatpush1.bf16.msra.mxu0 %v4231_v10  ;;  %v264_v39 = vrot.slane %v259_v31, %v263_v28  ;;  %v268_v40 = vrot.slane %v259_v31, %v267_v32  ;;  %v272_v41 = vrot.slane %v259_v31, %v271_v33  ;;  %v276_v45 = vrot.slane %v259_v31, %v275_v34 }
  0xf8   :  { %2917 = vmatpush1.bf16.msra.mxu1 %v4238_v12  ;;  %2887 = vmatprep.subr.bf16.mxu0 %v4240_v13 }
  0xf9   :  { %2919 = vmatprep.subr.bf16.mxu1 %v4243_v17 }
  0xfb   :  { %2889 = vmatpush1.bf16.msra.mxu0 %v4247_v23 }
  0xfc   :  { %2921 = vmatpush1.bf16.msra.mxu1 %v4252_v24  ;;  %2891 = vmatprep.subr.bf16.mxu0 %v4254_v25 }
  0xfd   :  { %2923 = vmatprep.subr.bf16.mxu1 %v4257_v29 }
  0xff   :  { %2893 = vmatpush1.bf16.msra.mxu0 %v4260_v35 }
 0x100   :  { %2925 = vmatpush1.bf16.msra.mxu1 %v4264_v36  ;;  %2895 = vmatprep.subr.bf16.mxu0 %v4266_v37 }
 0x101   :  { %2927 = vmatprep.subr.bf16.mxu1 %v4269_v43 }
 0x103   :  { %2897 = vmatpush1.bf16.msra.mxu0 %v4272_v52 }
 0x104   :  { %2929 = vmatpush1.bf16.msra.mxu1 %v4276_v53  ;;  %2899 = vmatprep.subr.bf16.mxu0 %v4278_v54 }
 0x105   :  { %2931 = vmatprep.subr.bf16.mxu1 %v4281_v59 }
 0x107   :  { %2901 = vmatpush1.bf16.msra.mxu0 %v4284_v6 }
 0x108   :  { %2933 = vmatpush1.bf16.msra.mxu1 %v4288_v7  ;;  %2903 = vmatprep.subr.bf16.mxu0 %v4290_v8 }
 0x109   :  { %2935 = vmatprep.subr.bf16.mxu1 %v4293_v14 }
 0x10b   :  { %2905 = vmatpush1.bf16.msra.mxu0 %v4296_v18 }
 0x10c   :  { %2937 = vmatpush1.bf16.msra.mxu1 %v4300_v19  ;;  %2939 = vmatprep.subr.bf16.mxu0 %v4199_v38 }
 0x10d   :  { %2971 = vmatprep.subr.bf16.mxu1 %v4201_v42 }
 0x10e   :  { %564 = vmatmul.mubr.f32.vlgmr.msra.gmra.mrb[4].mxu0 %v3937_v0 }
 0x10f   :  { %635 = vmatmul.mubr.f32.vlgmr.msra.gmra.mrb[4].mxu1 %v3937_v0  ;;  %2941 = vmatpush1.bf16.msra.mxu0 %v4206_v49 }
 0x110   :  { %2973 = vmatpush1.bf16.msra.mxu1 %v4209_v50  ;;  %2943 = vmatprep.subr.bf16.mxu0 %v4211_v51 }
 0x111   :  { %2975 = vmatprep.subr.bf16.mxu1 %v4214_v55  ;;  %733 = vmatprep.mubr.f32.mxu0 %v3937_v0 }
 0x112   :  { %804 = vmatprep.mubr.f32.mxu1 %v3937_v0 }
 0x113   :  { %2945 = vmatpush1.bf16.msra.mxu0 %v4217_v61 }
 0x114   :  { %2977 = vmatpush1.bf16.msra.mxu1 %v4221_v62  ;;  %2947 = vmatprep.subr.bf16.mxu0 %v4223_v63 }
 0x115   :  { %2979 = vmatprep.subr.bf16.mxu1 %v4226_v4 }
 0x117   :  { %2949 = vmatpush1.bf16.msra.mxu0 %v4231_v10 }
 0x118   :  { %2981 = vmatpush1.bf16.msra.mxu1 %v4238_v12  ;;  %2951 = vmatprep.subr.bf16.mxu0 %v4240_v13 }
 0x119   :  { %2983 = vmatprep.subr.bf16.mxu1 %v4243_v17 }
 0x11b   :  { %2953 = vmatpush1.bf16.msra.mxu0 %v4247_v23 }
 0x11c   :  { %2985 = vmatpush1.bf16.msra.mxu1 %v4252_v24  ;;  %2955 = vmatprep.subr.bf16.mxu0 %v4254_v25 }
 0x11d   :  { %2987 = vmatprep.subr.bf16.mxu1 %v4257_v29 }
 0x11f   :  { %2957 = vmatpush1.bf16.msra.mxu0 %v4260_v35 }
 0x120   :  { %2989 = vmatpush1.bf16.msra.mxu1 %v4264_v36  ;;  %2959 = vmatprep.subr.bf16.mxu0 %v4266_v37 }
 0x121   :  { %2991 = vmatprep.subr.bf16.mxu1 %v4269_v43 }
 0x123   :  { %2961 = vmatpush1.bf16.msra.mxu0 %v4272_v52 }
 0x124   :  { %2993 = vmatpush1.bf16.msra.mxu1 %v4276_v53  ;;  %2963 = vmatprep.subr.bf16.mxu0 %v4278_v54 }
 0x125   :  { %2995 = vmatprep.subr.bf16.mxu1 %v4281_v59 }
 0x127   :  { %2965 = vmatpush1.bf16.msra.mxu0 %v4284_v6 }
 0x128   :  { %2997 = vmatpush1.bf16.msra.mxu1 %v4288_v7  ;;  %2967 = vmatprep.subr.bf16.mxu0 %v4290_v8 }
 0x129   :  { %2999 = vmatprep.subr.bf16.mxu1 %v4293_v14 }
 0x12b   :  { %2969 = vmatpush1.bf16.msra.mxu0 %v4296_v18 }
 0x12c   :  { %3001 = vmatpush1.bf16.msra.mxu1 %v4300_v19  ;;  %3003 = vmatprep.subr.bf16.mxu0 %v4199_v38 }
 0x12d   :  { %3035 = vmatprep.subr.bf16.mxu1 %v4201_v42 }
 0x1c1   :  { %v347_v22 = vpop.f32.mrb[0].mxu0 }
 0x1c2   :  { %v349_v26 = vpop.f32.mrb[1].mxu0  ;;  %v424_v27 = vpop.f32.mrb[0].mxu1  ;;  %v4351_v1 = vadd.f32 %v347_v22, %v264_v39 }
 0x1c3   :  { %v426_v30 = vpop.f32.mrb[1].mxu1  ;;  %v4353_v2 = vadd.f32 %v349_v26, %v268_v40  ;;  %v4360_v22 = vadd.f32 %v424_v27, %v272_v41 }
 0x1c4   :  { %v4357_v28 = vadd.f32 %v426_v30, %v276_v45 }
 0x1c5   :  { %v353_v44 = vpop.f32.mrb[2].mxu0 }
 0x1c6   :  { %v4343_v46 = vadd.f32 %v353_v44, %v264_v39  ;;  %v355_v47 = vpop.f32.mrb[3].mxu0  ;;  %v430_v48 = vpop.f32.mrb[2].mxu1 }
 0x1c7   :  { %v4345_v56 = vadd.f32 %v355_v47, %v268_v40  ;;  %v4347_v57 = vadd.f32 %v430_v48, %v272_v41  ;;  %v432_v58 = vpop.f32.mrb[3].mxu1 }
 0x1c8   :  { %v4349_v60 = vadd.f32 %v432_v58, %v276_v45 }
 0x1e1   :  { %v565_v3 = vpop.f32.mrb[4].mxu0 }
 0x1e2   :  { %v641_v5 = vadd.f32 %v565_v3, %v4351_v1  ;;  %v636_v9 = vpop.f32.mrb[4].mxu1  ;;  %v567_v11 = vpop.f32.mrb[5].mxu0 }
 0x1e3   :  { %v642_v15 = vadd.f32 %v567_v11, %v4353_v2  ;;  %v638_v16 = vpop.f32.mrb[5].mxu1  ;;  %v643_v32 = vadd.f32 %v636_v9, %v4360_v22 }
 0x1e4   :  { %v2533_v20 = vmul.f32 -1.442695, %v641_v5  ;;  %v644_v31 = vadd.f32 %v638_v16, %v4357_v28 }
 0x1e5   :  { %v2534_v21 = vmul.f32 -1.442695, %v642_v15 }
 0x1e6   :  { %3516 = vpow2.f32 %v2533_v20  ;;  %v2535_v26 = vmul.f32 -1.442695, %v644_v31 }
 0x1e7   :  { %3518 = vpow2.f32 %v2534_v21 }
 0x1e8   :  { %3520 = vpow2.f32 %v2535_v26 }
 0x1e9   :  { %3522 = vtanh.f32 %v643_v32 }
 0x1f0   :  { %v3517_v33 = vpop.eup %3516 }
 0x1f1   :  { %v3519_v34 = vpop.eup %3518  ;;  %v648_v39 = vadd.f32 1.0, %v3517_v33 }
 0x1f2   :  { %v654_v40 = vadd.f32 1.0, %v3519_v34  ;;  %v3521_v44 = vpop.eup %3520 }
 0x1f3   :  { %3524 = vrcp.f32 %v648_v39  ;;  %v3523_v47 = vpop.eup %3522  ;;  %v661_v58 = vadd.f32 1.0, %v3521_v44 }
 0x1f4   :  { %3526 = vrcp.f32 %v654_v40 }
 0x1f5   :  { %3528 = vrcp.f32 %v661_v58 }
 0x1fd   :  { %v3525_v30 = vpop.eup %3524 }
 0x1fe   :  { %v3527_v45 = vpop.eup %3526  ;;  %v665_v48 = vmul.f32 %v3525_v30, %v3523_v47 }
 0x1ff   :  { %v664_v3 = vmul.f32 0.0, %v3527_v45  ;;  %v3529_v41 = vpop.eup %3528 }
 0x201   :  { %v4363_v27 = vadd.f32 %v665_v48, %v664_v3 }
 0x203   :  { %3530 = vtanh.f32 %v4363_v27 }
 0x20d   :  { %v3531_v5 = vpop.eup %3530 }
 0x20e   :  { %v668_v9 = vmul.f32 %v3531_v5, %v3529_v41 }
 0x210   :  { %734 = vmatmul.mubr.f32.vlgmr.msra.gmra.mrb[6].mxu0 %v668_v9  ;;  %805 = vmatmul.mubr.f32.vlgmr.msra.gmra.mrb[6].mxu1 %v668_v9 }
 0x211   :  { %3005 = vmatpush1.bf16.msra.mxu0 %v4206_v49  ;;  %3037 = vmatpush1.bf16.msra.mxu1 %v4209_v50 }
 0x212   :  { %3007 = vmatprep.subr.bf16.mxu0 %v4211_v51  ;;  %3039 = vmatprep.subr.bf16.mxu1 %v4214_v55 }
 0x213   :  { %921 = vmatprep.mubr.f32.mxu0 %v3937_v0  ;;  %992 = vmatprep.mubr.f32.mxu1 %v3937_v0 }
 0x215   :  { %3009 = vmatpush1.bf16.msra.mxu0 %v4217_v61  ;;  %3041 = vmatpush1.bf16.msra.mxu1 %v4221_v62 }
 0x216   :  { %3011 = vmatprep.subr.bf16.mxu0 %v4223_v63  ;;  %3043 = vmatprep.subr.bf16.mxu1 %v4226_v4 }
 0x219   :  { %3013 = vmatpush1.bf16.msra.mxu0 %v4231_v10  ;;  %3045 = vmatpush1.bf16.msra.mxu1 %v4238_v12 }
 0x21a   :  { %3015 = vmatprep.subr.bf16.mxu0 %v4240_v13  ;;  %3047 = vmatprep.subr.bf16.mxu1 %v4243_v17 }
 0x21d   :  { %3017 = vmatpush1.bf16.msra.mxu0 %v4247_v23  ;;  %3049 = vmatpush1.bf16.msra.mxu1 %v4252_v24 }
 0x21e   :  { %3019 = vmatprep.subr.bf16.mxu0 %v4254_v25  ;;  %3051 = vmatprep.subr.bf16.mxu1 %v4257_v29 }
 0x221   :  { %3021 = vmatpush1.bf16.msra.mxu0 %v4260_v35  ;;  %3053 = vmatpush1.bf16.msra.mxu1 %v4264_v36 }
 0x222   :  { %3023 = vmatprep.subr.bf16.mxu0 %v4266_v37  ;;  %3055 = vmatprep.subr.bf16.mxu1 %v4269_v43 }
 0x225   :  { %3025 = vmatpush1.bf16.msra.mxu0 %v4272_v52  ;;  %3057 = vmatpush1.bf16.msra.mxu1 %v4276_v53 }
 0x226   :  { %3027 = vmatprep.subr.bf16.mxu0 %v4278_v54  ;;  %3059 = vmatprep.subr.bf16.mxu1 %v4281_v59 }
 0x229   :  { %3029 = vmatpush1.bf16.msra.mxu0 %v4284_v6  ;;  %3061 = vmatpush1.bf16.msra.mxu1 %v4288_v7 }
 0x22a   :  { %3031 = vmatprep.subr.bf16.mxu0 %v4290_v8  ;;  %3063 = vmatprep.subr.bf16.mxu1 %v4293_v14 }
 0x22d   :  { %3033 = vmatpush1.bf16.msra.mxu0 %v4296_v18  ;;  %3065 = vmatpush1.bf16.msra.mxu1 %v4300_v19 }
 0x22e   :  { %3067 = vmatprep.subr.bf16.mxu0 %v4199_v38  ;;  %3099 = vmatprep.subr.bf16.mxu1 %v4201_v42 }
 0x2e3   :  { %v735_v11 = vpop.f32.mrb[6].mxu0  ;;  %v806_v15 = vpop.f32.mrb[6].mxu1 }
 0x2e4   :  { %v815_v16 = vrot.slane %v735_v11, 6  ;;  %v737_v20 = vpop.f32.mrb[7].mxu0  ;;  %v808_v21 = vpop.f32.mrb[7].mxu1  ;;  %v817_v44 = vrot.slane %v806_v15, 6  ;;  %v847_v11 = vrot.slane %v4363_v27, 6 }
 0x2e5   :  { %v816_v31 = vrot.slane %v737_v20, 6  ;;  %v818_v39 = vrot.slane %v808_v21, 6 }
 0x2e6   :  { %v823_v26 = vadd.f32 %v815_v16, %v4351_v1  ;;  %v825_v30 = vadd.f32 %v817_v44, %v4360_v22 }
 0x2e7   :  { %v824_v32 = vadd.f32 %v816_v31, %v4353_v2  ;;  %v826_v40 = vadd.f32 %v818_v39, %v4357_v28 }
 0x2e8   :  { %v2536_v33 = vmul.f32 -1.442695, %v823_v26 }
 0x2e9   :  { %v2537_v34 = vmul.f32 -1.442695, %v824_v32  ;;  %v2538_v47 = vmul.f32 -1.442695, %v826_v40 }
 0x2ea   :  { %3532 = vpow2.f32 %v2536_v33 }
 0x2eb   :  { %3534 = vpow2.f32 %v2537_v34 }
 0x2ec   :  { %3536 = vpow2.f32 %v2538_v47 }
 0x2ed   :  { %3538 = vtanh.f32 %v825_v30 }
 0x2f4   :  { %v3533_v45 = vpop.eup %3532 }
 0x2f5   :  { %v3535_v48 = vpop.eup %3534  ;;  %v830_v58 = vadd.f32 1.0, %v3533_v45 }
 0x2f6   :  { %v836_v3 = vadd.f32 1.0, %v3535_v48  ;;  %v3537_v41 = vpop.eup %3536 }
 0x2f7   :  { %3540 = vrcp.f32 %v830_v58  ;;  %v3539_v5 = vpop.eup %3538  ;;  %v843_v21 = vadd.f32 1.0, %v3537_v41 }
 0x2f8   :  { %3542 = vrcp.f32 %v836_v3 }
 0x2f9   :  { %3544 = vrcp.f32 %v843_v21 }
 0x301   :  { %v3541_v9 = vpop.eup %3540 }
 0x302   :  { %v3543_v16 = vpop.eup %3542  ;;  %v850_v20 = vmul.f32 %v3541_v9, %v3539_v5 }
 0x303   :  { %v849_v15 = vmul.f32 %v3543_v16, %v847_v11  ;;  %v3545_v26 = vpop.eup %3544 }
 0x305   :  { %v4405_v31 = vadd.f32 %v850_v20, %v849_v15 }
 0x307   :  { %3546 = vtanh.f32 %v4405_v31 }
 0x311   :  { %v3547_v32 = vpop.eup %3546 }
 0x312   :  { %v853_v33 = vmul.f32 %v3547_v32, %v3545_v26 }
 0x314   :  { %v855_v34 = vrot.slane %v853_v33, 2 }
 0x316   :  { %922 = vmatmul.mubr.f32.vlgmr.msra.gmra.mrb[8].mxu0 %v855_v34  ;;  %993 = vmatmul.mubr.f32.vlgmr.msra.gmra.mrb[8].mxu1 %v855_v34 }
 0x317   :  { %3069 = vmatpush1.bf16.msra.mxu0 %v4206_v49  ;;  %3101 = vmatpush1.bf16.msra.mxu1 %v4209_v50 }
 0x318   :  { %3071 = vmatprep.subr.bf16.mxu0 %v4211_v51  ;;  %3103 = vmatprep.subr.bf16.mxu1 %v4214_v55 }
 0x319   :  { %1109 = vmatprep.mubr.f32.mxu0 %v3937_v0  ;;  %1180 = vmatprep.mubr.f32.mxu1 %v3937_v0 }
 0x31b   :  { %3073 = vmatpush1.bf16.msra.mxu0 %v4217_v61  ;;  %3105 = vmatpush1.bf16.msra.mxu1 %v4221_v62 }
 0x31c   :  { %3075 = vmatprep.subr.bf16.mxu0 %v4223_v63  ;;  %3107 = vmatprep.subr.bf16.mxu1 %v4226_v4 }
 0x31f   :  { %3077 = vmatpush1.bf16.msra.mxu0 %v4231_v10  ;;  %3109 = vmatpush1.bf16.msra.mxu1 %v4238_v12 }
 0x320   :  { %3079 = vmatprep.subr.bf16.mxu0 %v4240_v13  ;;  %3111 = vmatprep.subr.bf16.mxu1 %v4243_v17 }
 0x323   :  { %3081 = vmatpush1.bf16.msra.mxu0 %v4247_v23  ;;  %3113 = vmatpush1.bf16.msra.mxu1 %v4252_v24 }
 0x324   :  { %3083 = vmatprep.subr.bf16.mxu0 %v4254_v25  ;;  %3115 = vmatprep.subr.bf16.mxu1 %v4257_v29 }
 0x327   :  { %3085 = vmatpush1.bf16.msra.mxu0 %v4260_v35  ;;  %3117 = vmatpush1.bf16.msra.mxu1 %v4264_v36 }
 0x328   :  { %3087 = vmatprep.subr.bf16.mxu0 %v4266_v37  ;;  %3119 = vmatprep.subr.bf16.mxu1 %v4269_v43 }
 0x32b   :  { %3089 = vmatpush1.bf16.msra.mxu0 %v4272_v52  ;;  %3121 = vmatpush1.bf16.msra.mxu1 %v4276_v53 }
 0x32c   :  { %3091 = vmatprep.subr.bf16.mxu0 %v4278_v54  ;;  %3123 = vmatprep.subr.bf16.mxu1 %v4281_v59 }
 0x32f   :  { %3093 = vmatpush1.bf16.msra.mxu0 %v4284_v6  ;;  %3125 = vmatpush1.bf16.msra.mxu1 %v4288_v7 }
 0x330   :  { %3095 = vmatprep.subr.bf16.mxu0 %v4290_v8  ;;  %3127 = vmatprep.subr.bf16.mxu1 %v4293_v14 }
 0x333   :  { %3097 = vmatpush1.bf16.msra.mxu0 %v4296_v18  ;;  %3129 = vmatpush1.bf16.msra.mxu1 %v4300_v19 }
 0x334   :  { %3131 = vmatprep.subr.bf16.mxu0 %v4199_v38  ;;  %3163 = vmatprep.subr.bf16.mxu1 %v4201_v42 }
 0x3e9   :  { %v923_v27 = vpop.f32.mrb[8].mxu0  ;;  %v994_v39 = vpop.f32.mrb[8].mxu1 }
 0x3ea   :  { %v1003_v40 = vrot.slane %v923_v27, 4  ;;  %v925_v44 = vpop.f32.mrb[9].mxu0  ;;  %v996_v47 = vpop.f32.mrb[9].mxu1  ;;  %v1005_v9 = vrot.slane %v994_v39, 4  ;;  %v1035_v27 = vrot.slane %v4405_v31, 6 }
 0x3eb   :  { %v1004_v30 = vrot.slane %v925_v44, 4  ;;  %v1006_v41 = vrot.slane %v996_v47, 4 }
 0x3ec   :  { %v1011_v45 = vadd.f32 %v1003_v40, %v4351_v1  ;;  %v1013_v16 = vadd.f32 %v1005_v9, %v4360_v22 }
 0x3ed   :  { %v1012_v48 = vadd.f32 %v1004_v30, %v4353_v2  ;;  %v1014_v5 = vadd.f32 %v1006_v41, %v4357_v28 }
 0x3ee   :  { %v2539_v58 = vmul.f32 -1.442695, %v1011_v45 }
 0x3ef   :  { %v2540_v3 = vmul.f32 -1.442695, %v1012_v48  ;;  %v2541_v11 = vmul.f32 -1.442695, %v1014_v5 }
 0x3f0   :  { %3548 = vpow2.f32 %v2539_v58 }
 0x3f1   :  { %3550 = vpow2.f32 %v2540_v3 }
 0x3f2   :  { %3552 = vpow2.f32 %v2541_v11 }
 0x3f3   :  { %3554 = vtanh.f32 %v1013_v16 }
 0x3fa   :  { %v3549_v20 = vpop.eup %3548 }
 0x3fb   :  { %v3551_v21 = vpop.eup %3550  ;;  %v1018_v15 = vadd.f32 1.0, %v3549_v20 }
 0x3fc   :  { %v1024_v26 = vadd.f32 1.0, %v3551_v21  ;;  %v3553_v32 = vpop.eup %3552 }
 0x3fd   :  { %3556 = vrcp.f32 %v1018_v15  ;;  %v3555_v33 = vpop.eup %3554  ;;  %v1031_v47 = vadd.f32 1.0, %v3553_v32 }
 0x3fe   :  { %3558 = vrcp.f32 %v1024_v26 }
 0x3ff   :  { %3560 = vrcp.f32 %v1031_v47 }
 0x407   :  { %v3557_v34 = vpop.eup %3556 }
 0x408   :  { %v3559_v40 = vpop.eup %3558  ;;  %v1038_v44 = vmul.f32 %v3557_v34, %v3555_v33 }
 0x409   :  { %v1037_v39 = vmul.f32 %v3559_v40, %v1035_v27  ;;  %v3561_v45 = vpop.eup %3560 }
 0x40b   :  { %v4447_v30 = vadd.f32 %v1038_v44, %v1037_v39 }
 0x40d   :  { %3562 = vtanh.f32 %v4447_v30 }
 0x417   :  { %v3563_v48 = vpop.eup %3562 }
 0x418   :  { %v1041_v58 = vmul.f32 %v3563_v48, %v3561_v45 }
 0x41a   :  { %v1043_v3 = vrot.slane %v1041_v58, 4  ;;  %v1223_v58 = vrot.slane %v4447_v30, 6 }
 0x41c   :  { %1110 = vmatmul.mubr.f32.vlgmr.msra.gmra.mrb[10].mxu0 %v1043_v3  ;;  %1181 = vmatmul.mubr.f32.vlgmr.msra.gmra.mrb[10].mxu1 %v1043_v3 }
 0x41d   :  { %3133 = vmatpush1.bf16.msra.mxu0 %v4206_v49  ;;  %3165 = vmatpush1.bf16.msra.mxu1 %v4209_v50 }
 0x41e   :  { %3135 = vmatprep.subr.bf16.mxu0 %v4211_v51  ;;  %3167 = vmatprep.subr.bf16.mxu1 %v4214_v55 }
 0x41f   :  { %1297 = vmatprep.mubr.f32.mxu0 %v3937_v0  ;;  %1368 = vmatprep.mubr.f32.mxu1 %v3937_v0 }
 0x421   :  { %3137 = vmatpush1.bf16.msra.mxu0 %v4217_v61  ;;  %3169 = vmatpush1.bf16.msra.mxu1 %v4221_v62 }
 0x422   :  { %3139 = vmatprep.subr.bf16.mxu0 %v4223_v63  ;;  %3171 = vmatprep.subr.bf16.mxu1 %v4226_v4 }
 0x425   :  { %3141 = vmatpush1.bf16.msra.mxu0 %v4231_v10  ;;  %3173 = vmatpush1.bf16.msra.mxu1 %v4238_v12 }
 0x426   :  { %3143 = vmatprep.subr.bf16.mxu0 %v4240_v13  ;;  %3175 = vmatprep.subr.bf16.mxu1 %v4243_v17 }
 0x429   :  { %3145 = vmatpush1.bf16.msra.mxu0 %v4247_v23  ;;  %3177 = vmatpush1.bf16.msra.mxu1 %v4252_v24 }
 0x42a   :  { %3147 = vmatprep.subr.bf16.mxu0 %v4254_v25  ;;  %3179 = vmatprep.subr.bf16.mxu1 %v4257_v29 }
 0x42d   :  { %3149 = vmatpush1.bf16.msra.mxu0 %v4260_v35  ;;  %3181 = vmatpush1.bf16.msra.mxu1 %v4264_v36 }
 0x42e   :  { %3151 = vmatprep.subr.bf16.mxu0 %v4266_v37  ;;  %3183 = vmatprep.subr.bf16.mxu1 %v4269_v43 }
 0x431   :  { %3153 = vmatpush1.bf16.msra.mxu0 %v4272_v52  ;;  %3185 = vmatpush1.bf16.msra.mxu1 %v4276_v53 }
 0x432   :  { %3155 = vmatprep.subr.bf16.mxu0 %v4278_v54  ;;  %3187 = vmatprep.subr.bf16.mxu1 %v4281_v59 }
 0x435   :  { %3157 = vmatpush1.bf16.msra.mxu0 %v4284_v6  ;;  %3189 = vmatpush1.bf16.msra.mxu1 %v4288_v7 }
 0x436   :  { %3159 = vmatprep.subr.bf16.mxu0 %v4290_v8  ;;  %3191 = vmatprep.subr.bf16.mxu1 %v4293_v14 }
 0x439   :  { %3161 = vmatpush1.bf16.msra.mxu0 %v4296_v18  ;;  %3193 = vmatpush1.bf16.msra.mxu1 %v4300_v19 }
 0x43a   :  { %3195 = vmatprep.subr.bf16.mxu0 %v4199_v38  ;;  %3227 = vmatprep.subr.bf16.mxu1 %v4201_v42 }
 0x4ef   :  { %v1111_v31 = vpop.f32.mrb[10].mxu0  ;;  %v1182_v41 = vpop.f32.mrb[10].mxu1 }
 0x4f0   :  { %v1191_v5 = vrot.slane %v1111_v31, 2  ;;  %v1113_v9 = vpop.f32.mrb[11].mxu0  ;;  %v1184_v11 = vpop.f32.mrb[11].mxu1  ;;  %v1193_v34 = vrot.slane %v1182_v41, 2 }
 0x4f1   :  { %v1192_v16 = vrot.slane %v1113_v9, 2  ;;  %v1194_v32 = vrot.slane %v1184_v11, 2 }
 0x4f2   :  { %v1199_v20 = vadd.f32 %v1191_v5, %v4351_v1  ;;  %v1201_v40 = vadd.f32 %v1193_v34, %v4360_v22 }
 0x4f3   :  { %v1200_v21 = vadd.f32 %v1192_v16, %v4353_v2  ;;  %v1202_v33 = vadd.f32 %v1194_v32, %v4357_v28 }
 0x4f4   :  { %v2542_v15 = vmul.f32 -1.442695, %v1199_v20 }
 0x4f5   :  { %v2543_v26 = vmul.f32 -1.442695, %v1200_v21  ;;  %v2544_v27 = vmul.f32 -1.442695, %v1202_v33 }
 0x4f6   :  { %3564 = vpow2.f32 %v2542_v15 }
 0x4f7   :  { %3566 = vpow2.f32 %v2543_v26 }
 0x4f8   :  { %3568 = vpow2.f32 %v2544_v27 }
 0x4f9   :  { %3570 = vtanh.f32 %v1201_v40 }
 0x500   :  { %v3565_v44 = vpop.eup %3564 }
 0x501   :  { %v3567_v47 = vpop.eup %3566  ;;  %v1206_v39 = vadd.f32 1.0, %v3565_v44 }
 0x502   :  { %v1212_v45 = vadd.f32 1.0, %v3567_v47  ;;  %v3569_v1 = vpop.eup %3568 }
 0x503   :  { %3572 = vrcp.f32 %v1206_v39  ;;  %v3571_v2 = vpop.eup %3570  ;;  %v1219_v28 = vadd.f32 1.0, %v3569_v1 }
 0x504   :  { %3574 = vrcp.f32 %v1212_v45 }
 0x505   :  { %3576 = vrcp.f32 %v1219_v28 }
 0x50d   :  { %v3573_v48 = vpop.eup %3572 }
 0x50e   :  { %v3575_v3 = vpop.eup %3574  ;;  %v1226_v31 = vmul.f32 %v3573_v48, %v3571_v2 }
 0x50f   :  { %v1225_v41 = vmul.f32 %v3575_v3, %v1223_v58  ;;  %v3577_v22 = vpop.eup %3576 }
 0x511   :  { %v4489_v5 = vadd.f32 %v1226_v31, %v1225_v41 }
 0x513   :  { %3578 = vtanh.f32 %v4489_v5  ;;  %v1399_v3 = vrot.slane %v4489_v5, 6 }
 0x51d   :  { %v3579_v9 = vpop.eup %3578 }
 0x51e   :  { %v1229_v11 = vmul.f32 %v3579_v9, %v3577_v22 }
 0x520   :  { %v1231_v16 = vrot.slane %v1229_v11, 6 }
 0x522   :  { %1298 = vmatmul.mubr.f32.vlgmr.msra.gmra.mrb[12].mxu0 %v1231_v16  ;;  %1369 = vmatmul.mubr.f32.vlgmr.msra.gmra.mrb[12].mxu1 %v1231_v16 }
 0x523   :  { %3197 = vmatpush1.bf16.msra.mxu0 %v4206_v49  ;;  %3229 = vmatpush1.bf16.msra.mxu1 %v4209_v50 }
 0x524   :  { %3199 = vmatprep.subr.bf16.mxu0 %v4211_v51  ;;  %3231 = vmatprep.subr.bf16.mxu1 %v4214_v55 }
 0x525   :  { %1470 = vmatprep.mubr.f32.mxu0 %v3937_v0  ;;  %1541 = vmatprep.mubr.f32.mxu1 %v3937_v0 }
 0x527   :  { %3201 = vmatpush1.bf16.msra.mxu0 %v4217_v61  ;;  %3233 = vmatpush1.bf16.msra.mxu1 %v4221_v62 }
 0x528   :  { %3203 = vmatprep.subr.bf16.mxu0 %v4223_v63  ;;  %3235 = vmatprep.subr.bf16.mxu1 %v4226_v4 }
 0x52b   :  { %3205 = vmatpush1.bf16.msra.mxu0 %v4231_v10  ;;  %3237 = vmatpush1.bf16.msra.mxu1 %v4238_v12 }
 0x52c   :  { %3207 = vmatprep.subr.bf16.mxu0 %v4240_v13  ;;  %3239 = vmatprep.subr.bf16.mxu1 %v4243_v17 }
 0x52f   :  { %3209 = vmatpush1.bf16.msra.mxu0 %v4247_v23  ;;  %3241 = vmatpush1.bf16.msra.mxu1 %v4252_v24 }
 0x530   :  { %3211 = vmatprep.subr.bf16.mxu0 %v4254_v25  ;;  %3243 = vmatprep.subr.bf16.mxu1 %v4257_v29 }
 0x533   :  { %3213 = vmatpush1.bf16.msra.mxu0 %v4260_v35  ;;  %3245 = vmatpush1.bf16.msra.mxu1 %v4264_v36 }
 0x534   :  { %3215 = vmatprep.subr.bf16.mxu0 %v4266_v37  ;;  %3247 = vmatprep.subr.bf16.mxu1 %v4269_v43 }
 0x537   :  { %3217 = vmatpush1.bf16.msra.mxu0 %v4272_v52  ;;  %3249 = vmatpush1.bf16.msra.mxu1 %v4276_v53 }
 0x538   :  { %3219 = vmatprep.subr.bf16.mxu0 %v4278_v54  ;;  %3251 = vmatprep.subr.bf16.mxu1 %v4281_v59 }
 0x53b   :  { %3221 = vmatpush1.bf16.msra.mxu0 %v4284_v6  ;;  %3253 = vmatpush1.bf16.msra.mxu1 %v4288_v7 }
 0x53c   :  { %3223 = vmatprep.subr.bf16.mxu0 %v4290_v8  ;;  %3255 = vmatprep.subr.bf16.mxu1 %v4293_v14 }
 0x53f   :  { %3225 = vmatpush1.bf16.msra.mxu0 %v4296_v18  ;;  %3257 = vmatpush1.bf16.msra.mxu1 %v4300_v19 }
 0x540   :  { %3259 = vmatprep.subr.bf16.mxu0 %v4199_v38  ;;  %3291 = vmatprep.subr.bf16.mxu1 %v4201_v42 }
 0x5f5   :  { %v1299_v30 = vpop.f32.mrb[12].mxu0  ;;  %v1370_v20 = vpop.f32.mrb[12].mxu1 }
 0x5f6   :  { %v1375_v21 = vadd.f32 %v1299_v30, %v4343_v46  ;;  %v1301_v15 = vpop.f32.mrb[13].mxu0  ;;  %v1372_v26 = vpop.f32.mrb[13].mxu1  ;;  %v1377_v44 = vadd.f32 %v1370_v20, %v4347_v57 }
 0x5f7   :  { %v1376_v32 = vadd.f32 %v1301_v15, %v4345_v56  ;;  %v1378_v27 = vadd.f32 %v1372_v26, %v4349_v60 }
 0x5f8   :  { %v2545_v33 = vmul.f32 -1.442695, %v1375_v21 }
 0x5f9   :  { %v2546_v34 = vmul.f32 -1.442695, %v1376_v32  ;;  %v2547_v40 = vmul.f32 -1.442695, %v1378_v27 }
 0x5fa   :  { %3580 = vpow2.f32 %v2545_v33 }
 0x5fb   :  { %3582 = vpow2.f32 %v2546_v34 }
 0x5fc   :  { %3584 = vpow2.f32 %v2547_v40 }
 0x5fd   :  { %3586 = vtanh.f32 %v1377_v44 }
 0x604   :  { %v3581_v47 = vpop.eup %3580 }
 0x605   :  { %v3583_v39 = vpop.eup %3582  ;;  %v1382_v45 = vadd.f32 1.0, %v3581_v47 }
 0x606   :  { %v1388_v1 = vadd.f32 1.0, %v3583_v39  ;;  %v3585_v2 = vpop.eup %3584 }
 0x607   :  { %3588 = vrcp.f32 %v1382_v45  ;;  %v3587_v48 = vpop.eup %3586  ;;  %v1395_v41 = vadd.f32 1.0, %v3585_v2 }
 0x608   :  { %3590 = vrcp.f32 %v1388_v1 }
 0x609   :  { %3592 = vrcp.f32 %v1395_v41 }
 0x611   :  { %v3589_v58 = vpop.eup %3588 }
 0x612   :  { %v3591_v31 = vpop.eup %3590  ;;  %v1402_v28 = vmul.f32 %v3589_v58, %v3587_v48 }
 0x613   :  { %v1401_v22 = vmul.f32 %v3591_v31, %v1399_v3  ;;  %v3593_v11 = vpop.eup %3592 }
 0x615   :  { %v4531_v9 = vadd.f32 %v1402_v28, %v1401_v22 }
 0x617   :  { %3594 = vtanh.f32 %v4531_v9  ;;  %v1584_v28 = vrot.slane %v4531_v9, 6 }
 0x621   :  { %v3595_v16 = vpop.eup %3594 }
 0x622   :  { %v1405_v30 = vmul.f32 %v3595_v16, %v3593_v11 }
 0x624   :  { %1471 = vmatmul.mubr.f32.vlgmr.msra.gmra.mrb[14].mxu0 %v1405_v30  ;;  %1542 = vmatmul.mubr.f32.vlgmr.msra.gmra.mrb[14].mxu1 %v1405_v30 }
 0x625   :  { %3261 = vmatpush1.bf16.msra.mxu0 %v4206_v49  ;;  %3293 = vmatpush1.bf16.msra.mxu1 %v4209_v50 }
 0x626   :  { %3263 = vmatprep.subr.bf16.mxu0 %v4211_v51  ;;  %3295 = vmatprep.subr.bf16.mxu1 %v4214_v55 }
 0x627   :  { %1658 = vmatprep.mubr.f32.mxu0 %v3937_v0  ;;  %1729 = vmatprep.mubr.f32.mxu1 %v3937_v0 }
 0x629   :  { %3265 = vmatpush1.bf16.msra.mxu0 %v4217_v61  ;;  %3297 = vmatpush1.bf16.msra.mxu1 %v4221_v62 }
 0x62a   :  { %3267 = vmatprep.subr.bf16.mxu0 %v4223_v63  ;;  %3299 = vmatprep.subr.bf16.mxu1 %v4226_v4 }
 0x62d   :  { %3269 = vmatpush1.bf16.msra.mxu0 %v4231_v10  ;;  %3301 = vmatpush1.bf16.msra.mxu1 %v4238_v12 }
 0x62e   :  { %3271 = vmatprep.subr.bf16.mxu0 %v4240_v13  ;;  %3303 = vmatprep.subr.bf16.mxu1 %v4243_v17 }
 0x631   :  { %3273 = vmatpush1.bf16.msra.mxu0 %v4247_v23  ;;  %3305 = vmatpush1.bf16.msra.mxu1 %v4252_v24 }
 0x632   :  { %3275 = vmatprep.subr.bf16.mxu0 %v4254_v25  ;;  %3307 = vmatprep.subr.bf16.mxu1 %v4257_v29 }
 0x635   :  { %3277 = vmatpush1.bf16.msra.mxu0 %v4260_v35  ;;  %3309 = vmatpush1.bf16.msra.mxu1 %v4264_v36 }
 0x636   :  { %3279 = vmatprep.subr.bf16.mxu0 %v4266_v37  ;;  %3311 = vmatprep.subr.bf16.mxu1 %v4269_v43 }
 0x639   :  { %3281 = vmatpush1.bf16.msra.mxu0 %v4272_v52  ;;  %3313 = vmatpush1.bf16.msra.mxu1 %v4276_v53 }
 0x63a   :  { %3283 = vmatprep.subr.bf16.mxu0 %v4278_v54  ;;  %3315 = vmatprep.subr.bf16.mxu1 %v4281_v59 }
 0x63d   :  { %3285 = vmatpush1.bf16.msra.mxu0 %v4284_v6  ;;  %3317 = vmatpush1.bf16.msra.mxu1 %v4288_v7 }
 0x63e   :  { %3287 = vmatprep.subr.bf16.mxu0 %v4290_v8  ;;  %3319 = vmatprep.subr.bf16.mxu1 %v4293_v14 }
 0x641   :  { %3289 = vmatpush1.bf16.msra.mxu0 %v4296_v18  ;;  %3321 = vmatpush1.bf16.msra.mxu1 %v4300_v19 }
 0x642   :  { %3323 = vmatprep.subr.bf16.mxu0 %v4199_v38  ;;  %3355 = vmatprep.subr.bf16.mxu1 %v4201_v42 }
 0x6f7   :  { %v1472_v5 = vpop.f32.mrb[14].mxu0  ;;  %v1543_v20 = vpop.f32.mrb[14].mxu1 }
 0x6f8   :  { %v1552_v21 = vrot.slane %v1472_v5, 6  ;;  %v1474_v15 = vpop.f32.mrb[15].mxu0  ;;  %v1545_v26 = vpop.f32.mrb[15].mxu1  ;;  %v1554_v38 = vrot.slane %v1543_v20, 6 }
 0x6f9   :  { %v1553_v32 = vrot.slane %v1474_v15, 6  ;;  %v1555_v44 = vrot.slane %v1545_v26, 6 }
 0x6fa   :  { %v1560_v33 = vadd.f32 %v1552_v21, %v4343_v46  ;;  %v1562_v42 = vadd.f32 %v1554_v38, %v4347_v57  ;;  %v1971_v38 = vld [vmem:[%s4789_s5 + $0x20] sm:$0xff] }
 0x6fb   :  { %v1561_v34 = vadd.f32 %v1553_v32, %v4345_v56  ;;  %v1563_v47 = vadd.f32 %v1555_v44, %v4349_v60  ;;  %v1967_v32 = vld [vmem:[%s4789_s5] sm:$0xff]  ;;  %v1970_v44 = vld [vmem:[%s4789_s5 + $0x18] sm:$0xff] }
 0x6fc   :  { %v2548_v27 = vmul.f32 -1.442695, %v1560_v33  ;;  %v1968_v33 = vld [vmem:[%s4789_s5 + $0x8] sm:$0xff] }
 0x6fd   :  { %v2549_v40 = vmul.f32 -1.442695, %v1561_v34  ;;  %v2550_v39 = vmul.f32 -1.442695, %v1563_v47  ;;  %v3387_v34 = vpack.c.bf16 %v1968_v33, %v1967_v32 }
 0x6fe   :  { %3596 = vpow2.f32 %v2548_v27  ;;  %v3938_v27 = vmov 0.0|0.0  }
 0x6ff   :  { %3598 = vpow2.f32 %v2549_v40  ;;  %v1969_v40 = vld [vmem:[%s4789_s5 + $0x10] sm:$0xff] }
 0x700   :  { %3600 = vpow2.f32 %v2550_v39  ;;  %v3390_v47 = vpack.c.bf16 %v1970_v44, %v1969_v40  ;;  %v1972_v39 = vld [vmem:[%s4789_s5 + $0x28] sm:$0xff]  ;;  %v2238_v44 = vld [vmem:[%s4795_s11] sm:$0xff] }
 0x701   :  { %3602 = vtanh.f32 %v1562_v42  ;;  %v3393_v42 = vpack.c.bf16 %v1972_v39, %v1971_v38  ;;  %v2240_v39 = vld [vmem:[%s4795_s11 + $0x10] sm:$0xff] }
 0x708   :  { %v3597_v45 = vpop.eup %3596 }
 0x709   :  { %v3599_v1 = vpop.eup %3598  ;;  %v1567_v2 = vadd.f32 1.0, %v3597_v45  ;;  %v1973_v45 = vld [vmem:[%s4789_s5 + $0x30] sm:$0xff] }
 0x70a   :  { %v1573_v48 = vadd.f32 1.0, %v3599_v1  ;;  %v3601_v58 = vpop.eup %3600  ;;  %v1974_v1 = vld [vmem:[%s4789_s5 + $0x38] sm:$0xff] }
 0x70b   :  { %3604 = vrcp.f32 %v1567_v2  ;;  %v3603_v3 = vpop.eup %3602  ;;  %v1580_v11 = vadd.f32 1.0, %v3601_v58  ;;  %v3396_v2 = vpack.c.bf16 %v1974_v1, %v1973_v45  ;;  %v1976_v58 = vld [vmem:[%s4789_s5 + $0x48] sm:$0xff]  ;;  %v2242_v1 = vld [vmem:[%s4795_s11 + $0x20] sm:$0xff] }
 0x70c   :  { %3606 = vrcp.f32 %v1573_v48  ;;  %v1975_v48 = vld [vmem:[%s4789_s5 + $0x40] sm:$0xff] }
 0x70d   :  { %3608 = vrcp.f32 %v1580_v11  ;;  %v1980_v11 = vld [vmem:[%s4789_s5 + $0x68] sm:$0xff] }
 0x715   :  { %v3605_v31 = vpop.eup %3604 }
 0x716   :  { %v3607_v41 = vpop.eup %3606  ;;  %v1587_v22 = vmul.f32 %v3605_v31, %v3603_v3  ;;  %v3399_v3 = vpack.c.bf16 %v1976_v58, %v1975_v48  ;;  %v1977_v31 = vld [vmem:[%s4789_s5 + $0x50] sm:$0xff] }
 0x717   :  { %v1586_v16 = vmul.f32 %v3607_v41, %v1584_v28  ;;  %v3609_v5 = vpop.eup %3608  ;;  %v1978_v28 = vld [vmem:[%s4789_s5 + $0x58] sm:$0xff]  ;;  %v2244_v58 = vld [vmem:[%s4795_s11 + $0x30] sm:$0xff] }
 0x718   :  { %v3402_v41 = vpack.c.bf16 %v1978_v28, %v1977_v31  ;;  %v2246_v28 = vld [vmem:[%s4795_s11 + $0x40] sm:$0xff] }
 0x719   :  { %v4573_v30 = vadd.f32 %v1587_v22, %v1586_v16  ;;  %v1979_v22 = vld [vmem:[%s4789_s5 + $0x60] sm:$0xff] }
 0x71a   :  { %v3405_v16 = vpack.c.bf16 %v1980_v11, %v1979_v22  ;;  %v2248_v11 = vld [vmem:[%s4795_s11 + $0x50] sm:$0xff] }
 0x71b   :  { %3610 = vtanh.f32 %v4573_v30 }
 0x725   :  { %v3611_v20 = vpop.eup %3610 }
 0x726   :  { %v1590_v21 = vmul.f32 %v3611_v20, %v3609_v5  ;;  %v1982_v5 = vld [vmem:[%s4789_s5 + $0x78] sm:$0xff] }
 0x728   :  { %v1592_v15 = vrot.slane %v1590_v21, 2  ;;  %v2148_v21 = vld [vmem:[#allocation11] sm:$0xff] }
 0x72a   :  { %1659 = vmatmul.mubr.f32.vlgmr.msra.gmra.mrb[16].mxu0 %v1592_v15  ;;  %1730 = vmatmul.mubr.f32.vlgmr.msra.gmra.mrb[16].mxu1 %v1592_v15  ;;  %v2149_v15 = vld [vmem:[#allocation11 + $0x8] sm:$0xff] }
 0x72b   :  { %3325 = vmatpush1.bf16.msra.mxu0 %v4206_v49  ;;  %3357 = vmatpush1.bf16.msra.mxu1 %v4209_v50 }
 0x72c   :  { %3327 = vmatprep.subr.bf16.mxu0 %v4211_v51  ;;  %3359 = vmatprep.subr.bf16.mxu1 %v4214_v55 }
 0x72d   :  { %1846 = vmatprep.mubr.f32.mxu0 %v3937_v0  ;;  %1917 = vmatprep.mubr.f32.mxu1 %v3937_v0 }
 0x72f   :  { %3329 = vmatpush1.bf16.msra.mxu0 %v4217_v61  ;;  %3361 = vmatpush1.bf16.msra.mxu1 %v4221_v62 }
 0x730   :  { %3331 = vmatprep.subr.bf16.mxu0 %v4223_v63  ;;  %3363 = vmatprep.subr.bf16.mxu1 %v4226_v4 }
 0x733   :  { %3333 = vmatpush1.bf16.msra.mxu0 %v4231_v10  ;;  %3365 = vmatpush1.bf16.msra.mxu1 %v4238_v12 }
 0x734   :  { %3335 = vmatprep.subr.bf16.mxu0 %v4240_v13  ;;  %3367 = vmatprep.subr.bf16.mxu1 %v4243_v17 }
 0x737   :  { %3337 = vmatpush1.bf16.msra.mxu0 %v4247_v23  ;;  %3369 = vmatpush1.bf16.msra.mxu1 %v4252_v24 }
 0x738   :  { %3339 = vmatprep.subr.bf16.mxu0 %v4254_v25  ;;  %3371 = vmatprep.subr.bf16.mxu1 %v4257_v29 }
 0x73b   :  { %3341 = vmatpush1.bf16.msra.mxu0 %v4260_v35  ;;  %3373 = vmatpush1.bf16.msra.mxu1 %v4264_v36 }
 0x73c   :  { %3343 = vmatprep.subr.bf16.mxu0 %v4266_v37  ;;  %3375 = vmatprep.subr.bf16.mxu1 %v4269_v43 }
 0x73f   :  { %3345 = vmatpush1.bf16.msra.mxu0 %v4272_v52  ;;  %3377 = vmatpush1.bf16.msra.mxu1 %v4276_v53 }
 0x740   :  { %3347 = vmatprep.subr.bf16.mxu0 %v4278_v54  ;;  %3379 = vmatprep.subr.bf16.mxu1 %v4281_v59  ;;  %v1772_v54 = vrot.slane %v4573_v30, 6  ;;  %v1981_v30 = vld [vmem:[%s4789_s5 + $0x70] sm:$0xff] }
 0x741   :  { %v3408_v20 = vpack.c.bf16 %v1982_v5, %v1981_v30  ;;  %v2250_v5 = vld [vmem:[%s4795_s11 + $0x60] sm:$0xff] }
 0x743   :  { %3349 = vmatpush1.bf16.msra.mxu0 %v4284_v6  ;;  %3381 = vmatpush1.bf16.msra.mxu1 %v4288_v7 }
 0x744   :  { %3351 = vmatprep.subr.bf16.mxu0 %v4290_v8  ;;  %3383 = vmatprep.subr.bf16.mxu1 %v4293_v14 }
 0x747   :  { %3353 = vmatpush1.bf16.msra.mxu0 %v4296_v18  ;;  %3385 = vmatpush1.bf16.msra.mxu1 %v4300_v19 }
 0x748   :  { %3386 = vmatprep.subr.bf16.mxu0 %v3938_v27  ;;  %3413 = vmatprep.subr.bf16.mxu1 %v3938_v27 }
 0x7fd   :  { %v1660_v49 = vpop.f32.mrb[16].mxu0  ;;  %v1731_v50 = vpop.f32.mrb[16].mxu1 }
 0x7fe   :  { %v1740_v51 = vrot.slane %v1660_v49, 4  ;;  %v1662_v55 = vpop.f32.mrb[17].mxu0  ;;  %v1733_v61 = vpop.f32.mrb[17].mxu1  ;;  %v1742_v23 = vrot.slane %v1731_v50, 4  ;;  %v3414_v49 = vpack.c.bf16 %v2149_v15, %v2148_v21  ;;  %v2150_v50 = vld [vmem:[#allocation11 + $0x10] sm:$0xff]  ;;  %v2252_v15 = vld [vmem:[%s4795_s11 + $0x70] sm:$0xff] }
 0x7ff   :  { %v1741_v62 = vrot.slane %v1662_v55, 4  ;;  %v1743_v13 = vrot.slane %v1733_v61, 4 }
 0x800   :  { %v1748_v63 = vadd.f32 %v1740_v51, %v4343_v46  ;;  %v1750_v25 = vadd.f32 %v1742_v23, %v4347_v57  ;;  %v2151_v51 = vld [vmem:[#allocation11 + $0x18] sm:$0xff] }
 0x801   :  { %v1749_v4 = vadd.f32 %v1741_v62, %v4345_v56  ;;  %v1751_v17 = vadd.f32 %v1743_v13, %v4349_v60  ;;  %v3417_v55 = vpack.c.bf16 %v2151_v51, %v2150_v50  ;;  %v2152_v51 = vld [vmem:[#allocation11 + $0x20] sm:$0xff] }
 0x802   :  { %v2551_v10 = vmul.f32 -1.442695, %v1748_v63 }
 0x803   :  { %v2552_v12 = vmul.f32 -1.442695, %v1749_v4  ;;  %v2553_v24 = vmul.f32 -1.442695, %v1751_v17 }
 0x804   :  { %3612 = vpow2.f32 %v2551_v10 }
 0x805   :  { %3614 = vpow2.f32 %v2552_v12 }
 0x806   :  { %3616 = vpow2.f32 %v2553_v24 }
 0x807   :  { %3618 = vtanh.f32 %v1750_v25 }
 0x80e   :  { %v3613_v29 = vpop.eup %3612 }
 0x80f   :  { %v3615_v35 = vpop.eup %3614  ;;  %v1755_v36 = vadd.f32 1.0, %v3613_v29 }
 0x810   :  { %v1761_v37 = vadd.f32 1.0, %v3615_v35  ;;  %v3617_v43 = vpop.eup %3616 }
 0x811   :  { %3620 = vrcp.f32 %v1755_v36  ;;  %v3619_v52 = vpop.eup %3618  ;;  %v1768_v7 = vadd.f32 1.0, %v3617_v43 }
 0x812   :  { %3622 = vrcp.f32 %v1761_v37 }
 0x813   :  { %3624 = vrcp.f32 %v1768_v7 }
 0x81b   :  { %v3621_v53 = vpop.eup %3620 }
 0x81c   :  { %v3623_v59 = vpop.eup %3622  ;;  %v1775_v6 = vmul.f32 %v3621_v53, %v3619_v52 }
 0x81d   :  { %v1774_v8 = vmul.f32 %v3623_v59, %v1772_v54  ;;  %v3625_v18 = vpop.eup %3624 }
 0x81f   :  { %v4613_v14 = vadd.f32 %v1775_v6, %v1774_v8 }
 0x821   :  { %3626 = vtanh.f32 %v4613_v14  ;;  %v1960_v6 = vrot.slane %v4613_v14, 6  ;;  %v2239_v14 = vld [vmem:[%s4795_s11 + $0x8] sm:$0xff] }
 0x822   :  { %v3450_v38 = vpack.c.bf16 %v2239_v14, %v2238_v44  ;;  %v2269_v44 = vld [vmem:[#allocation14 + $0x78] sm:$0xff] }
 0x82b   :  { %v3627_v19 = vpop.eup %3626 }
 0x82c   :  { %v1778_v9 = vmul.f32 %v3627_v19, %v3625_v18 }
 0x82e   :  { %v1780_v26 = vrot.slane %v1778_v9, 4  ;;  %v2064_v9 = vld [vmem:[#allocation8] sm:$0xff] }
 0x830   :  { %1847 = vmatmul.mubr.f32.vlgmr.msra.gmra.mrb[18].mxu0 %v1780_v26  ;;  %1918 = vmatmul.mubr.f32.vlgmr.msra.gmra.mrb[18].mxu1 %v1780_v26  ;;  %v2065_v26 = vld [vmem:[#allocation8 + $0x8] sm:$0xff] }
 0x831   :  { %3388 = vmatpush3.bf16.msra.mxu0 %v3387_v34  ;;  %2676 = vmatprep.mubr.msk.f32.mxu0 %vm3939_vm0, %v3937_v0  ;;  %v3411_v34 = vpack.c.bf16 %v2065_v26, %v2064_v9  ;;  %v2265_v9 = vld [vmem:[#allocation14 + $0x58] sm:$0xff] }
 0x832   :  { %3389 = vmatprep.subr.bf16.mxu0 %v3938_v27  ;;  %2702 = vmatprep.mubr.msk.f32.mxu1 %vm3939_vm0, %v3937_v0 }
 0x833   :  { %3415 = vmatpush3.bf16.msra.mxu1 %v3414_v49  ;;  %v2253_v49 = vld [vmem:[%s4795_s11 + $0x78] sm:$0xff] }
 0x834   :  { %3416 = vmatprep.subr.bf16.mxu1 %v3938_v27  ;;  %v3471_v50 = vpack.c.bf16 %v2253_v49, %v2252_v15  ;;  %v2428_v15 = vld [vmem:[#allocation17 + $0x48] sm:$0xff] }
 0x835   :  { %3391 = vmatpush3.bf16.msra.mxu0 %v3390_v47  ;;  %v2063_v47 = vld [vmem:[%s4785_s1] sm:$0x3] }
 0x836   :  { %3392 = vmatprep.subr.bf16.mxu0 %v3938_v27 }
 0x837   :  { %3418 = vmatpush3.bf16.msra.mxu1 %v3417_v55  ;;  %v2153_v55 = vld [vmem:[#allocation11 + $0x28] sm:$0xff] }
 0x838   :  { %3419 = vmatprep.subr.bf16.mxu1 %v3938_v27 }
 0x839   :  { %3394 = vmatpush3.bf16.msra.mxu0 %v3393_v42  ;;  %v2241_v42 = vld [vmem:[%s4795_s11 + $0x18] sm:$0xff] }
 0x83a   :  { %3395 = vmatprep.subr.bf16.mxu0 %v3938_v27  ;;  %v3453_v45 = vpack.c.bf16 %v2241_v42, %v2240_v39  ;;  %v2560_v39 = vld [vmem:[#allocation13] ss:$0 sm:$0xff]  ;;  %v2419_v42 = vld [vmem:[#allocation17] sm:$0xff] }
 0x83d   :  { %3397 = vmatpush3.bf16.msra.mxu0 %v3396_v2  ;;  %v2243_v2 = vld [vmem:[%s4795_s11 + $0x28] sm:$0xff] }
 0x83e   :  { %3398 = vmatprep.subr.bf16.mxu0 %v3938_v27  ;;  %v3456_v48 = vpack.c.bf16 %v2243_v2, %v2242_v1 }
 0x841   :  { %3400 = vmatpush3.bf16.msra.mxu0 %v3399_v3  ;;  %v2245_v3 = vld [vmem:[%s4795_s11 + $0x38] sm:$0xff] }
 0x842   :  { %3401 = vmatprep.subr.bf16.mxu0 %v3938_v27  ;;  %v3459_v31 = vpack.c.bf16 %v2245_v3, %v2244_v58 }
 0x845   :  { %3403 = vmatpush3.bf16.msra.mxu0 %v3402_v41  ;;  %v2247_v41 = vld [vmem:[%s4795_s11 + $0x48] sm:$0xff] }
 0x846   :  { %3404 = vmatprep.subr.bf16.mxu0 %v3938_v27  ;;  %v3462_v22 = vpack.c.bf16 %v2247_v41, %v2246_v28  ;;  %v2422_v28 = vld [vmem:[#allocation17 + $0x18] sm:$0xff] }
 0x849   :  { %3406 = vmatpush3.bf16.msra.mxu0 %v3405_v16  ;;  %v2249_v16 = vld [vmem:[%s4795_s11 + $0x58] sm:$0xff] }
 0x84a   :  { %3407 = vmatprep.subr.bf16.mxu0 %v3938_v27  ;;  %v3465_v30 = vpack.c.bf16 %v2249_v16, %v2248_v11  ;;  %v2424_v11 = vld [vmem:[#allocation17 + $0x28] sm:$0xff] }
 0x84d   :  { %3409 = vmatpush3.bf16.msra.mxu0 %v3408_v20  ;;  %v2251_v20 = vld [vmem:[%s4795_s11 + $0x68] sm:$0xff] }
 0x84e   :  { %3410 = vmatprep.subr.bf16.mxu0 %v3938_v27  ;;  %v3468_v21 = vpack.c.bf16 %v2251_v20, %v2250_v5  ;;  %v2426_v5 = vld [vmem:[#allocation17 + $0x38] sm:$0xff] }
 0x903   :  { %v1848_v61 = vpop.f32.mrb[18].mxu0  ;;  %v1919_v62 = vpop.f32.mrb[18].mxu1 }
 0x904   :  { %v1928_v63 = vrot.slane %v1848_v61, 2  ;;  %v1850_v4 = vpop.f32.mrb[19].mxu0  ;;  %v1921_v10 = vpop.f32.mrb[19].mxu1  ;;  %v1930_v35 = vrot.slane %v1919_v62, 2  ;;  %v3420_v61 = vpack.c.bf16 %v2153_v55, %v2152_v51  ;;  %v2154_v62 = vld [vmem:[#allocation11 + $0x30] sm:$0xff]  ;;  %v2431_v55 = vld [vmem:[#allocation17 + $0x60] sm:$0xff] }
 0x905   :  { %v1929_v12 = vrot.slane %v1850_v4, 2  ;;  %v1931_v25 = vrot.slane %v1921_v10, 2  ;;  %v2557_v10 = vld [vmem:[%s4790_s6] ss:$0 sm:$0xff]  ;;  %s3940_s6 = smov [#allocation20]  }
 0x906   :  { %v1936_v13 = vadd.f32 %v1928_v63, %v4343_v46  ;;  %v1938_v37 = vadd.f32 %v1930_v35, %v4347_v57  ;;  %3421 = vmatpush3.bf16.msra.mxu1 %v3420_v61  ;;  %v2155_v63 = vld [vmem:[#allocation11 + $0x38] sm:$0xff]  ;;  %v2432_v61 = vld [vmem:[#allocation17 + $0x68] sm:$0xff]  ;;  %s2519_s11 = sshll.u32 %s3940_s6, 4  ;;  %s2520_s11 = int_to_ptr.vmem [resolvable:$true] %s2519_s11 }
 0x907   :  { %v1937_v17 = vadd.f32 %v1929_v12, %v4345_v56  ;;  %v1939_v29 = vadd.f32 %v1931_v25, %v4349_v60  ;;  %3422 = vmatprep.subr.bf16.mxu1 %v3938_v27  ;;  %v3423_v4 = vpack.c.bf16 %v2155_v63, %v2154_v62  ;;  %v2255_v25 = vld [vmem:[#allocation14 + $0x8] sm:$0xff]  ;;  %v3492_v62 = vpack.c.bf16 %v2432_v61, %v2431_v55  ;;  %v2433_v63 = vld [vmem:[#allocation17 + $0x70] sm:$0xff]  ;;  %s3886_s24 = scalar_lea.vmem %s2520_s11, 32  ;;  %p3891_p5 = scmp.lt.s32.totalorder %s2520_s11, %s2520_s11 }
 0x908   :  { %v2554_v23 = vmul.f32 -1.442695, %v1936_v13  ;;  %p3887_p4 = scmp.ne.s32.totalorder %s2520_s11, %s3886_s24  ;;  %p3892_p6 = scmp.lt.s32.totalorder %s3886_s24, %s3886_s24 }
 0x909   :  { %v2555_v24 = vmul.f32 -1.442695, %v1937_v17  ;;  %v2556_v36 = vmul.f32 -1.442695, %v1939_v29 }
 0x90a   :  { %3628 = vpow2.f32 %v2554_v23  ;;  %3424 = vmatpush3.bf16.msra.mxu1 %v3423_v4  ;;  %v2558_v23 = vld [vmem:[#allocation10] ss:$0 sm:$0xff]  ;;  %p3893_p7 = por %p3892_p6, %p3891_p5 }
 0x90b   :  { %3630 = vpow2.f32 %v2555_v24  ;;  %3425 = vmatprep.subr.bf16.mxu1 %v3938_v27  ;;  %v2254_v24 = vld [vmem:[#allocation14] sm:$0xff] }
 0x90c   :  { %3632 = vpow2.f32 %v2556_v36  ;;  %v2434_v4 = vld [vmem:[#allocation17 + $0x78] sm:$0xff]  ;;  %p3894_p8 = pnand %p3893_p7, %p3887_p4 }
 0x90d   :  { %3634 = vtanh.f32 %v1938_v37  ;;  %v3426_v37 = vpack.c.bf16 %v2255_v25, %v2254_v24 }
 0x914   :  { %v3629_v43 = vpop.eup %3628 }
 0x915   :  { %v3631_v52 = vpop.eup %3630  ;;  %v1943_v53 = vadd.f32 1.0, %v3629_v43 }
 0x916   :  { %v1949_v54 = vadd.f32 1.0, %v3631_v52  ;;  %v3633_v46 = vpop.eup %3632  ;;  %v2256_v52 = vld [vmem:[#allocation14 + $0x10] sm:$0xff] }
 0x917   :  { %3636 = vrcp.f32 %v1943_v53  ;;  %v3635_v56 = vpop.eup %3634  ;;  %v1956_v60 = vadd.f32 1.0, %v3633_v46  ;;  %v2257_v53 = vld [vmem:[#allocation14 + $0x18] sm:$0xff]  ;;  %v2258_v46 = vld [vmem:[#allocation14 + $0x20] sm:$0xff] }
 0x918   :  { %3638 = vrcp.f32 %v1949_v54  ;;  %v3429_v54 = vpack.c.bf16 %v2257_v53, %v2256_v52 }
 0x919   :  { %3640 = vrcp.f32 %v1956_v60  ;;  %v2262_v60 = vld [vmem:[#allocation14 + $0x40] sm:$0xff] }
 0x921   :  { %v3637_v59 = vpop.eup %3636 }
 0x922   :  { %v3639_v7 = vpop.eup %3638  ;;  %v1963_v8 = vmul.f32 %v3637_v59, %v3635_v56  ;;  %v2259_v56 = vld [vmem:[#allocation14 + $0x28] sm:$0xff] }
 0x923   :  { %v1962_v18 = vmul.f32 %v3639_v7, %v1960_v6  ;;  %v3641_v57 = vpop.eup %3640  ;;  %v3432_v59 = vpack.c.bf16 %v2259_v56, %v2258_v46  ;;  %v2260_v6 = vld [vmem:[#allocation14 + $0x30] sm:$0xff]  ;;  %v2261_v7 = vld [vmem:[#allocation14 + $0x38] sm:$0xff] }
 0x925   :  { %v1964_v19 = vadd.f32 %v1963_v8, %v1962_v18  ;;  %v3435_v8 = vpack.c.bf16 %v2261_v7, %v2260_v6  ;;  %v2263_v18 = vld [vmem:[#allocation14 + $0x48] sm:$0xff] }
 0x927   :  { %3642 = vtanh.f32 %v1964_v19  ;;  %v3438_v19 = vpack.c.bf16 %v2263_v18, %v2262_v60 }
 0x931   :  { %v3643_v32 = vpop.eup %3642 }
 0x932   :  { %v1966_v33 = vmul.f32 %v3643_v32, %v3641_v57  ;;  %v2264_v57 = vld [vmem:[#allocation14 + $0x50] sm:$0xff]  ;;  %v2266_v32 = vld [vmem:[#allocation14 + $0x60] sm:$0xff] }
 0x933   :  { %v3441_v26 = vpack.c.bf16 %v2265_v9, %v2264_v57 }
 0x934   :  { %v1991_v40 = vrot.slane %v1966_v33, 6  ;;  %v2267_v33 = vld [vmem:[#allocation14 + $0x68] sm:$0xff] }
 0x936   :  { %2677 = vmatmul.mubr.f32.vlgmr.msra.gmra.mrb[20].mxu0 %v1991_v40  ;;  %v2268_v40 = vld [vmem:[#allocation14 + $0x70] sm:$0xff] }
 0x937   :  { %3412 = vmatpush3.bf16.msra.mxu0 %v3411_v34  ;;  %2683 = vmatprep.mubr.msk.f32.mxu0 %vm3939_vm0, %v3937_v0  ;;  %v3444_v34 = vpack.c.bf16 %v2267_v33, %v2266_v32  ;;  %v3447_v14 = vpack.c.bf16 %v2269_v44, %v2268_v40 }
 0x938   :  { %3449 = vmatprep.subr.bf16.mxu0 %v3938_v27 }
 0x93a   :  { %2684 = vmatmul.mubr.msk.f32.vlgmr.msra.gmra.mrb[22].mxu0 %vm2073_vm1, %v2063_v47 }
 0x93b   :  { %3451 = vmatpush3.bf16.msra.mxu0 %v3450_v38  ;;  %2772 = vmatprep.mubr.msk.f32.mxu0 %vm3939_vm0, %v3937_v0 }
 0x93c   :  { %3452 = vmatprep.subr.bf16.mxu0 %v3938_v27 }
 0x93f   :  { %3454 = vmatpush3.bf16.msra.mxu0 %v3453_v45  ;;  %v2420_v45 = vld [vmem:[#allocation17 + $0x8] sm:$0xff] }
 0x940   :  { %3455 = vmatprep.subr.bf16.mxu0 %v3938_v27  ;;  %v3474_v58 = vpack.c.bf16 %v2420_v45, %v2419_v42 }
 0x943   :  { %3457 = vmatpush3.bf16.msra.mxu0 %v3456_v48 }
 0x944   :  { %3458 = vmatprep.subr.bf16.mxu0 %v3938_v27 }
 0x947   :  { %3460 = vmatpush3.bf16.msra.mxu0 %v3459_v31  ;;  %v2421_v31 = vld [vmem:[#allocation17 + $0x10] sm:$0xff] }
 0x948   :  { %3461 = vmatprep.subr.bf16.mxu0 %v3938_v27  ;;  %v3477_v41 = vpack.c.bf16 %v2422_v28, %v2421_v31 }
 0x94b   :  { %3463 = vmatpush3.bf16.msra.mxu0 %v3462_v22  ;;  %v2423_v22 = vld [vmem:[#allocation17 + $0x20] sm:$0xff] }
 0x94c   :  { %3464 = vmatprep.subr.bf16.mxu0 %v3938_v27  ;;  %v3480_v16 = vpack.c.bf16 %v2424_v11, %v2423_v22 }
 0x94f   :  { %3466 = vmatpush3.bf16.msra.mxu0 %v3465_v30  ;;  %v2425_v30 = vld [vmem:[#allocation17 + $0x30] sm:$0xff] }
 0x950   :  { %3467 = vmatprep.subr.bf16.mxu0 %v3938_v27  ;;  %v3483_v20 = vpack.c.bf16 %v2426_v5, %v2425_v30 }
 0x953   :  { %3469 = vmatpush3.bf16.msra.mxu0 %v3468_v21  ;;  %v2427_v21 = vld [vmem:[#allocation17 + $0x40] sm:$0xff] }
 0x954   :  { %3470 = vmatprep.subr.bf16.mxu0 %v3938_v27  ;;  %v3486_v49 = vpack.c.bf16 %v2428_v15, %v2427_v21 }
 0x957   :  { %3472 = vmatpush3.bf16.msra.mxu0 %v3471_v50  ;;  %v2430_v50 = vld [vmem:[#allocation17 + $0x58] sm:$0xff] }
 0xa09   :  { %v2059_v12 = vpop.f32.mrb[20].mxu0 }
 0xa0a   :  { %v2060_v13 = vadd.f32 %v2557_v10, %v2059_v12  ;;  %v2678_v17 = vpop.f32.mrb[21].mxu0  ;;  %v3495_v10 = vpack.c.bf16 %v2434_v4, %v2433_v63 }
 0xa0c   :  { %2773 = vmatmul.mubr.f32.vlgmr.msra.gmra.mrb[24].mxu0 %v2060_v13  ;;  %v2562_v13 = vld [vmem:[#allocation16] ss:$0 sm:$0xff] }
 0xa0d   :  { %v2143_v29 = vpop.f32.mrb[22].mxu0 }
 0xa0e   :  { %v2144_v35 = vadd.f32 %v2558_v23, %v2143_v29  ;;  %v2685_v36 = vpop.f32.mrb[23].mxu0  ;;  %v2563_v29 = vld [vmem:[#allocation19] ss:$0 sm:$0xff] }
 0xa10   :  { %v2147_v43 = vmax.f32 %v2144_v35, 0.0 }
 0xa12   :  { %2703 = vmatmul.mubr.msk.f32.vlgmr.msra.gmra.mrb[20].mxu1 %vm2163_vm2, %v2147_v43 }
 0xa13   :  { %3427 = vmatpush3.bf16.msra.mxu1 %v3426_v37  ;;  %2737 = vmatprep.mubr.msk.f32.mxu1 %vm3939_vm0, %v3937_v0 }
 0xa14   :  { %3428 = vmatprep.subr.bf16.mxu1 %v3938_v27 }
 0xa17   :  { %3430 = vmatpush3.bf16.msra.mxu1 %v3429_v54 }
 0xa18   :  { %3431 = vmatprep.subr.bf16.mxu1 %v3938_v27 }
 0xa1b   :  { %3433 = vmatpush3.bf16.msra.mxu1 %v3432_v59 }
 0xa1c   :  { %3434 = vmatprep.subr.bf16.mxu1 %v3938_v27 }
 0xa1f   :  { %3436 = vmatpush3.bf16.msra.mxu1 %v3435_v8 }
 0xa20   :  { %3437 = vmatprep.subr.bf16.mxu1 %v3938_v27 }
 0xa23   :  { %3439 = vmatpush3.bf16.msra.mxu1 %v3438_v19 }
 0xa24   :  { %3440 = vmatprep.subr.bf16.mxu1 %v3938_v27 }
 0xa27   :  { %3442 = vmatpush3.bf16.msra.mxu1 %v3441_v26 }
 0xa28   :  { %3443 = vmatprep.subr.bf16.mxu1 %v3938_v27 }
 0xa2b   :  { %3445 = vmatpush3.bf16.msra.mxu1 %v3444_v34 }
 0xa2c   :  { %3446 = vmatprep.subr.bf16.mxu1 %v3938_v27 }
 0xa2f   :  { %3448 = vmatpush3.bf16.msra.mxu1 %v3447_v14 }
 0xa30   :  { %3473 = vmatprep.subr.bf16.mxu1 %v3938_v27 }
 0xadf   :  { %v2406_v47 = vpop.f32.mrb[24].mxu0 }
 0xae0   :  { %v2774_v38 = vpop.f32.mrb[25].mxu0 }
 0xae5   :  { %v2233_v1 = vpop.f32.mrb[20].mxu1 }
 0xae6   :  { %v2234_v2 = vadd.f32 %v2560_v39, %v2233_v1  ;;  %v2704_v48 = vpop.f32.mrb[21].mxu1 }
 0xae8   :  { %v2237_v3 = vmax.f32 %v2234_v2, 0.0 }
 0xaea   :  { %2738 = vmatmul.mubr.f32.vlgmr.msra.gmra.mrb[22].mxu1 %v2237_v3 }
 0xaeb   :  { %3475 = vmatpush3.bf16.msra.mxu1 %v3474_v58  ;;  %2807 = vmatprep.mubr.msk.f32.mxu1 %vm3939_vm0, %v3937_v0  ;;  %v2429_v0 = vld [vmem:[#allocation17 + $0x50] sm:$0xff] }
 0xaec   :  { %3476 = vmatprep.subr.bf16.mxu1 %v3938_v27  ;;  %v3489_v51 = vpack.c.bf16 %v2430_v50, %v2429_v0 }
 0xaef   :  { %3478 = vmatpush3.bf16.msra.mxu1 %v3477_v41 }
 0xaf0   :  { %3479 = vmatprep.subr.bf16.mxu1 %v3938_v27 }
 0xaf3   :  { %3481 = vmatpush3.bf16.msra.mxu1 %v3480_v16 }
 0xaf4   :  { %3482 = vmatprep.subr.bf16.mxu1 %v3938_v27 }
 0xaf7   :  { %3484 = vmatpush3.bf16.msra.mxu1 %v3483_v20 }
 0xaf8   :  { %3485 = vmatprep.subr.bf16.mxu1 %v3938_v27 }
 0xafb   :  { %3487 = vmatpush3.bf16.msra.mxu1 %v3486_v49 }
 0xafc   :  { %3488 = vmatprep.subr.bf16.mxu1 %v3938_v27 }
 0xaff   :  { %3490 = vmatpush3.bf16.msra.mxu1 %v3489_v51 }
 0xb00   :  { %3491 = vmatprep.subr.bf16.mxu1 %v3938_v27 }
 0xb03   :  { %3493 = vmatpush3.bf16.msra.mxu1 %v3492_v62 }
 0xb04   :  { %3494 = vmatprep.subr.bf16.mxu1 %v3938_v27 }
 0xb07   :  { %3496 = vmatpush3.bf16.msra.mxu1 %v3495_v10 }
 0xbbd   :  { %v2336_v12 = vpop.f32.mrb[22].mxu1 }
 0xbbe   :  { %v2407_v17 = vadd.f32 %v2406_v47, %v2336_v12  ;;  %v2739_v23 = vpop.f32.mrb[23].mxu1 }
 0xbc0   :  { %v2417_v24 = vadd.f32 %v2562_v13, %v2407_v17 }
 0xbc2   :  { %v2418_v25 = vmax.f32 %v2417_v24, 0.0 }
 0xbc4   :  { %2808 = vmatmul.mubr.f32.vlgmr.msra.gmra.mrb[24].mxu1 %v2418_v25 }
 0xc97   :  { %v2508_v35 = vpop.f32.mrb[24].mxu1 }
 0xc98   :  { %v2509_v36 = vadd.f32 %v2563_v29, %v2508_v35  ;;  %v2809_v37 = vpop.f32.mrb[25].mxu1 }
 0xc9a   :  { %2512 = vst [vmem:[#allocation20] sm:$0x3] %v2509_v36 }
 0xc9b   :  { %3897 = shalt.err (!%p3894_p8)
}
 0xc9c   :  { %s3898_s17 = scalar_lea.hbm %s4800_s16, 32 }
 0xc9d   :  { %p3899_p9 = scmp.ne.s32.totalorder %s4800_s16, %s3898_s17  ;;  %p3902_p10 = scmp.lt.u32.totalorder %s3898_s17, %s4800_s16 }
 0xc9f   :  { %p3904_p11 = pnand %p3902_p10, %p3899_p9 }
 0xca1   :  { %3907 = shalt.err (!%p3904_p11)
}
 0xca2   :  { %2522 = dma.vmem_to_hbm [thread:$0]  %s2520_s11, 32, %s4800_s16, [#allocation4]  }
 0xca3   :  { %3920 = dma.done.wait [#allocation4], 32  }
 0xca4   :  { %3921 = vsyncadd [#allocation4], 4294967264 }
 0xca5   :  { %2526 = vsyncpa [#allocation3], 1 }
 0xca6   :  { %2527 = vsyncpa [#allocation6], 1 }
 0xca7   :  { %2528 = vsyncpa [#allocation9], 1 }
 0xca8   :  { %2529 = vsyncpa [#allocation12], 1 }
 0xca9   :  { %2530 = vsyncpa [#allocation15], 1 }
 0xcaa   :  { %2531 = vsyncpa [#allocation18], 1 }
 0xcab   :  { %2532 = vsyncpa [#allocation4], 1 }

</bundles_post_ra>
